<compile_context>
chip_gen: v7x
topology: tpu7x:2x2x1
jax: 0.10.0
libtpu: 0.0.40
codegen_flags: <defaults>
</compile_context>

<pallas_src>
import functools

import jax
import jax.numpy as jnp
from jax.experimental import pallas as pl
from jax.experimental.pallas import tpu as pltpu

HIDDEN = 200        # torch hidden width
HIDDEN_PAD = 256    # lane-aligned padded hidden width


def _round_up(n, m):
    return ((n + m - 1) // m) * m


def _chip_budget():
    """Pick (max batch-tile rows, scoped VMEM limit) per TPU generation."""
    vmem_cap = None
    try:
        vmem_cap = getattr(pltpu.get_tpu_info(), "vmem_capacity_bytes", None)
    except Exception:
        vmem_cap = None
    if vmem_cap is not None and vmem_cap <= 80 * 1024 * 1024:
        # v7x-class: 64 MiB VMEM per TensorCore -> smaller tiles, tighter limit.
        return 2048, 40 * 1024 * 1024
    # v5e / v6e: 128 MiB VMEM -> big batch tiles, 64 MiB scoped VMEM.
    return 4096, 64 * 1024 * 1024


def _softplus(x):
    # numerically-stable softplus, elementwise on the VPU/EUP
    return jnp.maximum(x, 0.0) + jnp.log1p(jnp.exp(-jnp.abs(x)))


def _sigmoid(x):
    # sigmoid via tanh: goes to the EUP slot, avoids an explicit f32 divide
    return 0.5 * (jnp.tanh(0.5 * x) + 1.0)


def vae_kernel(x_ref, eps_ref,
               w1_ref, b1_ref, w2_ref, b2_ref,
               wmv_ref, bmv_ref,
               wd1_ref, bd1_ref, wd2_ref, bd2_ref, wd3_ref, bd3_ref,
               xhat_ref, partial_ref,
               *, z_dim, tile_b, batch, has_pad):
    x = x_ref[...]                                   # (tile_b, x_dim) f32
    x_bf = x.astype(jnp.bfloat16)

    # --- Encoder: Linear(x_dim,256p) ReLU, Linear(256p,256p) ReLU (bf16 MXU, f32 acc) ---
    h = jnp.dot(x_bf, w1_ref[...], preferred_element_type=jnp.float32) + b1_ref[...]
    h = jnp.maximum(h, 0.0)
    h = jnp.dot(h.astype(jnp.bfloat16), w2_ref[...],
                preferred_element_type=jnp.float32) + b2_ref[...]
    h = jnp.maximum(h, 0.0)

    # --- Fused mean / var heads: one (256p, 2*z_dim) matmul, then slice ---
    hv = jnp.dot(h.astype(jnp.bfloat16), wmv_ref[...],
                 preferred_element_type=jnp.float32) + bmv_ref[...]
    mean = hv[:, :z_dim]
    var = _softplus(hv[:, z_dim:])

    # --- reparameterized sample: z = mean + sqrt(var + 1e-8) * eps ---
    z = mean + jnp.sqrt(var + 1e-8) * eps_ref[...]

    # --- Decoder: Linear(z,256p) ReLU, Linear(256p,256p) ReLU, Linear(256p,x_dim) Sigmoid ---
    d = jnp.dot(z.astype(jnp.bfloat16), wd1_ref[...],
                preferred_element_type=jnp.float32) + bd1_ref[...]
    d = jnp.maximum(d, 0.0)
    d = jnp.dot(d.astype(jnp.bfloat16), wd2_ref[...],
                preferred_element_type=jnp.float32) + bd2_ref[...]
    d = jnp.maximum(d, 0.0)
    logits = jnp.dot(d.astype(jnp.bfloat16), wd3_ref[...],
                     preferred_element_type=jnp.float32) + bd3_ref[...]
    xhat_ref[...] = _sigmoid(logits).astype(xhat_ref.dtype)   # bf16 HBM stream

    # --- per-row KL + Bernoulli reconstruction (reconstruction in logit space) ---
    kl_rows = 0.5 * jnp.sum(1.0 + jnp.log(var + 1e-8) - mean * mean - var,
                            axis=-1, keepdims=True)
    # x*log(sigmoid(l)) + (1-x)*log(1-sigmoid(l)) == x*l - softplus(l)
    rec_rows = jnp.sum(x * logits - _softplus(logits), axis=-1, keepdims=True)
    rows = kl_rows + rec_rows

    if has_pad:
        # row-validity mask for the zero-padded batch tail (only built when
        # the batch actually needed padding).
        i = pl.program_id(0)
        ridx = i * tile_b + jax.lax.broadcasted_iota(jnp.int32, (tile_b, 1), 0)
        rows = jnp.where(ridx < batch, rows, 0.0)

    # per-tile partial (KL + reconstruction); summed + negated in the wrapper
    partial_ref[0, 0] = jnp.sum(rows)


def init_linear(key, fan_in, fan_out):
    """Deterministic init mimicking torch.nn.Linear defaults (U(-1/sqrt(in), 1/sqrt(in)))."""
    kw, kb = jax.random.split(key)
    bound = 1.0 / float(fan_in) ** 0.5
    w = jax.random.uniform(kw, (fan_in, fan_out), jnp.float32, -bound, bound)
    b = jax.random.uniform(kb, (1, fan_out), jnp.float32, -bound, bound)
    return w, b


def make_params(key, x_dim, z_dim, hidden=HIDDEN, hidden_pad=HIDDEN_PAD):
    """Torch-equivalent init at the unpadded sizes, then zero-pad / fuse / cast to bf16."""
    keys = jax.random.split(key, 7)
    w1, b1 = init_linear(keys[0], x_dim, hidden)      # Encoder[0]
    w2, b2 = init_linear(keys[1], hidden, hidden)     # Encoder[2]
    wm, bm = init_linear(keys[2], hidden, z_dim)      # EncMean
    wv, bv = init_linear(keys[3], hidden, z_dim)      # EncVar[0]
    wd1, bd1 = init_linear(keys[4], z_dim, hidden)    # Decoder[0]
    wd2, bd2 = init_linear(keys[5], hidden, hidden)   # Decoder[2]
    wd3, bd3 = init_linear(keys[6], hidden, x_dim)    # Decoder[4]

    def pad2(a, rows, cols):
        return jnp.pad(a, ((0, rows - a.shape[0]), (0, cols - a.shape[1])))

    hp = hidden_pad
    bf16 = lambda w: w.astype(jnp.bfloat16)
    w1p, b1p = bf16(pad2(w1, x_dim, hp)), pad2(b1, 1, hp)
    w2p, b2p = bf16(pad2(w2, hp, hp)), pad2(b2, 1, hp)
    wmv = bf16(pad2(jnp.concatenate([wm, wv], axis=1), hp, 2 * z_dim))
    bmv = jnp.concatenate([bm, bv], axis=1)
    wd1p, bd1p = bf16(pad2(wd1, z_dim, hp)), pad2(bd1, 1, hp)
    wd2p, bd2p = bf16(pad2(wd2, hp, hp)), pad2(bd2, 1, hp)
    wd3p, bd3p = bf16(pad2(wd3, hp, x_dim)), pad2(bd3, 1, x_dim)

    return (w1p, b1p, w2p, b2p, wmv, bmv, wd1p, bd1p, wd2p, bd2p, wd3p, bd3p)


def linear_vae_forward(x_nchw, eps, params, resize, z_dim):
    B = x_nchw.shape[0]
    x_dim = resize * resize
    x2d = x_nchw.reshape(B, x_dim).astype(jnp.float32)   # same as torch .view(-1, x_dim)
    eps2d = eps.astype(jnp.float32)

    tile_b_max, vmem_limit = _chip_budget()
    tile_b = min(tile_b_max, _round_up(max(B, 1), 16))
    b_pad = _round_up(B, tile_b)
    has_pad = b_pad != B
    if has_pad:
        x2d = jnp.pad(x2d, ((0, b_pad - B), (0, 0)))
        eps2d = jnp.pad(eps2d, ((0, b_pad - B), (0, 0)))
    n_tiles = b_pad // tile_b
    grid = (n_tiles,)

    # weights/biases: full-array blocks, constant index_map -> VMEM-resident.
    param_specs = [pl.BlockSpec(p.shape, lambda i: (0, 0)) for p in params]

    grid_spec = pltpu.PrefetchScalarGridSpec(
        num_scalar_prefetch=0,
        grid=grid,
        in_specs=[pl.BlockSpec((tile_b, x_dim), lambda i: (i, 0)),
                  pl.BlockSpec((tile_b, z_dim), lambda i: (i, 0))] + param_specs,
        out_specs=(pl.BlockSpec((tile_b, x_dim), lambda i: (i, 0)),
                   pl.BlockSpec((1, 1), lambda i: (i, 0),
                                memory_space=pltpu.MemorySpace.SMEM)),
    )

    x_hat_pad, partials = pl.pallas_call(
        functools.partial(vae_kernel, z_dim=z_dim, tile_b=tile_b,
                          batch=B, has_pad=has_pad),
        out_shape=(jax.ShapeDtypeStruct((b_pad, x_dim), jnp.bfloat16),
                   jax.ShapeDtypeStruct((n_tiles, 1), jnp.float32)),
        grid_spec=grid_spec,
        compiler_params=pltpu.CompilerParams(
            # No cross-tile carry anymore (per-tile partial losses), so the
            # batch axis is "parallel" -> v7x can shard tiles over its 2 TCs.
            dimension_semantics=("parallel",),
            vmem_limit_bytes=vmem_limit),
    )(x2d, eps2d, *params)

    # lower = -(KL + reconstruction); sum a handful of per-tile scalars here.
    lower = -jnp.sum(partials)
    x_hat = x_hat_pad[:B].astype(jnp.float32).reshape(B, 1, resize, resize)
    return x_hat, lower


if __name__ == "__main__":
    resize = 16
    hidden_dim = 32          # args.hidden_dim (z_dim)
    batch = 2
    x_dim = resize * resize

    root = jax.random.PRNGKey(0)
    k_x, k_eps, k_params = jax.random.split(root, 3)

    # image-like input in [0, 1] (matches the Bernoulli reconstruction loss)
    x = jax.random.uniform(k_x, (batch, 1, resize, resize), jnp.float32)
    # Gaussian noise for the reparameterization trick (torch.randn equivalent)
    eps = jax.random.normal(k_eps, (batch, hidden_dim), jnp.float32)

    params = make_params(k_params, x_dim, hidden_dim)

    x_hat, lower = linear_vae_forward(x, eps, params, resize, hidden_dim)
    jax.block_until_ready((x_hat, lower))

    assert x_hat.shape == (batch, 1, resize, resize)
    assert lower.shape == ()
    assert bool(jnp.isfinite(lower))
    assert bool(jnp.all(jnp.isfinite(x_hat)))
    print("KERNEL_OK")
</pallas_src>

<mosaic_0001>
module attributes {stable_mosaic.version = 11 : i64} {
  func.func @vae_kernel(%arg0: i32, %arg1: memref<16x256xf32, #tpu.memory_space<vmem>>, %arg2: memref<16x32xf32, #tpu.memory_space<vmem>>, %arg3: memref<256x256xbf16, #tpu.memory_space<vmem>>, %arg4: memref<1x256xf32, #tpu.memory_space<vmem>>, %arg5: memref<256x256xbf16, #tpu.memory_space<vmem>>, %arg6: memref<1x256xf32, #tpu.memory_space<vmem>>, %arg7: memref<256x64xbf16, #tpu.memory_space<vmem>>, %arg8: memref<1x64xf32, #tpu.memory_space<vmem>>, %arg9: memref<32x256xbf16, #tpu.memory_space<vmem>>, %arg10: memref<1x256xf32, #tpu.memory_space<vmem>>, %arg11: memref<256x256xbf16, #tpu.memory_space<vmem>>, %arg12: memref<1x256xf32, #tpu.memory_space<vmem>>, %arg13: memref<256x256xbf16, #tpu.memory_space<vmem>>, %arg14: memref<1x256xf32, #tpu.memory_space<vmem>>, %arg15: memref<16x256xbf16, #tpu.memory_space<vmem>>, %arg16: memref<1x1xf32, #tpu.memory_space<smem>>) attributes {dimension_semantics = [#tpu.dimension_semantics<parallel>], iteration_bounds = array<i64: 1>, scalar_prefetch = 0 : i64, scratch_operands = 0 : i64, tpu.core_type = #tpu.core_type<tc>, window_params = [{transform_indices = @transform_0, window_bounds = array<i64: 16, 256>}, {transform_indices = @transform_1, window_bounds = array<i64: 16, 32>}, {pipeline_mode = #tpu.pipeline_mode<synchronous>, transform_indices = @transform_2, window_bounds = array<i64: 256, 256>}, {pipeline_mode = #tpu.pipeline_mode<synchronous>, transform_indices = @transform_3, window_bounds = array<i64: 1, 256>}, {pipeline_mode = #tpu.pipeline_mode<synchronous>, transform_indices = @transform_4, window_bounds = array<i64: 256, 256>}, {pipeline_mode = #tpu.pipeline_mode<synchronous>, transform_indices = @transform_5, window_bounds = array<i64: 1, 256>}, {pipeline_mode = #tpu.pipeline_mode<synchronous>, transform_indices = @transform_6, window_bounds = array<i64: 256, 64>}, {pipeline_mode = #tpu.pipeline_mode<synchronous>, transform_indices = @transform_7, window_bounds = array<i64: 1, 64>}, {pipeline_mode = #tpu.pipeline_mode<synchronous>, transform_indices = @transform_8, window_bounds = array<i64: 32, 256>}, {pipeline_mode = #tpu.pipeline_mode<synchronous>, transform_indices = @transform_9, window_bounds = array<i64: 1, 256>}, {pipeline_mode = #tpu.pipeline_mode<synchronous>, transform_indices = @transform_10, window_bounds = array<i64: 256, 256>}, {pipeline_mode = #tpu.pipeline_mode<synchronous>, transform_indices = @transform_11, window_bounds = array<i64: 1, 256>}, {pipeline_mode = #tpu.pipeline_mode<synchronous>, transform_indices = @transform_12, window_bounds = array<i64: 256, 256>}, {pipeline_mode = #tpu.pipeline_mode<synchronous>, transform_indices = @transform_13, window_bounds = array<i64: 1, 256>}, {transform_indices = @transform_14, window_bounds = array<i64: 16, 256>}, {transform_indices = @transform_15, window_bounds = array<i64: 1, 1>}]} {
    %c0 = arith.constant 0 : index
    %c0_0 = arith.constant 0 : index
    %0 = vector.load %arg1[%c0, %c0_0] : memref<16x256xf32, #tpu.memory_space<vmem>>, vector<16x256xf32>
    %1 = arith.truncf %0 : vector<16x256xf32> to vector<16x256xbf16>
    %c0_1 = arith.constant 0 : index
    %c0_2 = arith.constant 0 : index
    %2 = vector.load %arg3[%c0_1, %c0_2] : memref<256x256xbf16, #tpu.memory_space<vmem>>, vector<256x256xbf16>
    %cst = arith.constant dense<0.000000e+00> : vector<16x256xf32>
    %3 = tpu.matmul %1, %2, %cst {dimension_numbers = #tpu.dot_dimension_numbers<[1], [0], [0], [1], [0, 0, 1, 1], [], []>} : vector<16x256xbf16>, vector<256x256xbf16>, vector<16x256xf32> -> vector<16x256xf32>
    %c0_3 = arith.constant 0 : index
    %c0_4 = arith.constant 0 : index
    %4 = vector.load %arg4[%c0_3, %c0_4] : memref<1x256xf32, #tpu.memory_space<vmem>>, vector<1x256xf32>
    %5 = vector.broadcast %4 : vector<1x256xf32> to vector<16x256xf32>
    %6 = arith.addf %3, %5 : vector<16x256xf32>
    %cst_5 = arith.constant 0.000000e+00 : f32
    %7 = vector.broadcast %cst_5 : f32 to vector<16x256xf32>
    %8 = arith.maximumf %6, %7 : vector<16x256xf32>
    %9 = arith.truncf %8 : vector<16x256xf32> to vector<16x256xbf16>
    %c0_6 = arith.constant 0 : index
    %c0_7 = arith.constant 0 : index
    %10 = vector.load %arg5[%c0_6, %c0_7] : memref<256x256xbf16, #tpu.memory_space<vmem>>, vector<256x256xbf16>
    %cst_8 = arith.constant dense<0.000000e+00> : vector<16x256xf32>
    %11 = tpu.matmul %9, %10, %cst_8 {dimension_numbers = #tpu.dot_dimension_numbers<[1], [0], [0], [1], [0, 0, 1, 1], [], []>} : vector<16x256xbf16>, vector<256x256xbf16>, vector<16x256xf32> -> vector<16x256xf32>
    %c0_9 = arith.constant 0 : index
    %c0_10 = arith.constant 0 : index
    %12 = vector.load %arg6[%c0_9, %c0_10] : memref<1x256xf32, #tpu.memory_space<vmem>>, vector<1x256xf32>
    %13 = vector.broadcast %12 : vector<1x256xf32> to vector<16x256xf32>
    %14 = arith.addf %11, %13 : vector<16x256xf32>
    %cst_11 = arith.constant 0.000000e+00 : f32
    %15 = vector.broadcast %cst_11 : f32 to vector<16x256xf32>
    %16 = arith.maximumf %14, %15 : vector<16x256xf32>
    %17 = arith.truncf %16 : vector<16x256xf32> to vector<16x256xbf16>
    %c0_12 = arith.constant 0 : index
    %c0_13 = arith.constant 0 : index
    %18 = vector.load %arg7[%c0_12, %c0_13] : memref<256x64xbf16, #tpu.memory_space<vmem>>, vector<256x64xbf16>
    %cst_14 = arith.constant dense<0.000000e+00> : vector<16x64xf32>
    %19 = tpu.matmul %17, %18, %cst_14 {dimension_numbers = #tpu.dot_dimension_numbers<[1], [0], [0], [1], [0, 0, 1, 1], [], []>} : vector<16x256xbf16>, vector<256x64xbf16>, vector<16x64xf32> -> vector<16x64xf32>
    %c0_15 = arith.constant 0 : index
    %c0_16 = arith.constant 0 : index
    %20 = vector.load %arg8[%c0_15, %c0_16] : memref<1x64xf32, #tpu.memory_space<vmem>>, vector<1x64xf32>
    %21 = vector.broadcast %20 : vector<1x64xf32> to vector<16x64xf32>
    %22 = arith.addf %19, %21 : vector<16x64xf32>
    %23 = vector.extract_strided_slice %22 {offsets = [0, 0], sizes = [16, 32], strides = [1, 1]} : vector<16x64xf32> to vector<16x32xf32>
    %24 = vector.extract_strided_slice %22 {offsets = [0, 32], sizes = [16, 32], strides = [1, 1]} : vector<16x64xf32> to vector<16x32xf32>
    %cst_17 = arith.constant 0.000000e+00 : f32
    %25 = vector.broadcast %cst_17 : f32 to vector<16x32xf32>
    %26 = arith.maximumf %24, %25 : vector<16x32xf32>
    %27 = math.absf %24 : vector<16x32xf32>
    %cst_18 = arith.constant 0.000000e+00 : f32
    %28 = vector.broadcast %cst_18 : f32 to vector<16x32xf32>
    %29 = arith.subf %28, %27 : vector<16x32xf32>
    %30 = math.exp %29 : vector<16x32xf32>
    %31 = math.log1p %30 : vector<16x32xf32>
    %32 = arith.addf %26, %31 : vector<16x32xf32>
    %cst_19 = arith.constant 9.99999993E-9 : f32
    %33 = vector.broadcast %cst_19 : f32 to vector<16x32xf32>
    %34 = arith.addf %32, %33 : vector<16x32xf32>
    %35 = math.sqrt %34 : vector<16x32xf32>
    %c0_20 = arith.constant 0 : index
    %c0_21 = arith.constant 0 : index
    %36 = vector.load %arg2[%c0_20, %c0_21] : memref<16x32xf32, #tpu.memory_space<vmem>>, vector<16x32xf32>
    %37 = arith.mulf %35, %36 : vector<16x32xf32>
    %38 = arith.addf %23, %37 : vector<16x32xf32>
    %39 = arith.truncf %38 : vector<16x32xf32> to vector<16x32xbf16>
    %c0_22 = arith.constant 0 : index
    %c0_23 = arith.constant 0 : index
    %40 = vector.load %arg9[%c0_22, %c0_23] : memref<32x256xbf16, #tpu.memory_space<vmem>>, vector<32x256xbf16>
    %cst_24 = arith.constant dense<0.000000e+00> : vector<16x256xf32>
    %41 = tpu.matmul %39, %40, %cst_24 {dimension_numbers = #tpu.dot_dimension_numbers<[1], [0], [0], [1], [0, 0, 1, 1], [], []>} : vector<16x32xbf16>, vector<32x256xbf16>, vector<16x256xf32> -> vector<16x256xf32>
    %c0_25 = arith.constant 0 : index
    %c0_26 = arith.constant 0 : index
    %42 = vector.load %arg10[%c0_25, %c0_26] : memref<1x256xf32, #tpu.memory_space<vmem>>, vector<1x256xf32>
    %43 = vector.broadcast %42 : vector<1x256xf32> to vector<16x256xf32>
    %44 = arith.addf %41, %43 : vector<16x256xf32>
    %cst_27 = arith.constant 0.000000e+00 : f32
    %45 = vector.broadcast %cst_27 : f32 to vector<16x256xf32>
    %46 = arith.maximumf %44, %45 : vector<16x256xf32>
    %47 = arith.truncf %46 : vector<16x256xf32> to vector<16x256xbf16>
    %c0_28 = arith.constant 0 : index
    %c0_29 = arith.constant 0 : index
    %48 = vector.load %arg11[%c0_28, %c0_29] : memref<256x256xbf16, #tpu.memory_space<vmem>>, vector<256x256xbf16>
    %cst_30 = arith.constant dense<0.000000e+00> : vector<16x256xf32>
    %49 = tpu.matmul %47, %48, %cst_30 {dimension_numbers = #tpu.dot_dimension_numbers<[1], [0], [0], [1], [0, 0, 1, 1], [], []>} : vector<16x256xbf16>, vector<256x256xbf16>, vector<16x256xf32> -> vector<16x256xf32>
    %c0_31 = arith.constant 0 : index
    %c0_32 = arith.constant 0 : index
    %50 = vector.load %arg12[%c0_31, %c0_32] : memref<1x256xf32, #tpu.memory_space<vmem>>, vector<1x256xf32>
    %51 = vector.broadcast %50 : vector<1x256xf32> to vector<16x256xf32>
    %52 = arith.addf %49, %51 : vector<16x256xf32>
    %cst_33 = arith.constant 0.000000e+00 : f32
    %53 = vector.broadcast %cst_33 : f32 to vector<16x256xf32>
    %54 = arith.maximumf %52, %53 : vector<16x256xf32>
    %55 = arith.truncf %54 : vector<16x256xf32> to vector<16x256xbf16>
    %c0_34 = arith.constant 0 : index
    %c0_35 = arith.constant 0 : index
    %56 = vector.load %arg13[%c0_34, %c0_35] : memref<256x256xbf16, #tpu.memory_space<vmem>>, vector<256x256xbf16>
    %cst_36 = arith.constant dense<0.000000e+00> : vector<16x256xf32>
    %57 = tpu.matmul %55, %56, %cst_36 {dimension_numbers = #tpu.dot_dimension_numbers<[1], [0], [0], [1], [0, 0, 1, 1], [], []>} : vector<16x256xbf16>, vector<256x256xbf16>, vector<16x256xf32> -> vector<16x256xf32>
    %c0_37 = arith.constant 0 : index
    %c0_38 = arith.constant 0 : index
    %58 = vector.load %arg14[%c0_37, %c0_38] : memref<1x256xf32, #tpu.memory_space<vmem>>, vector<1x256xf32>
    %59 = vector.broadcast %58 : vector<1x256xf32> to vector<16x256xf32>
    %60 = arith.addf %57, %59 : vector<16x256xf32>
    %cst_39 = arith.constant 5.000000e-01 : f32
    %61 = vector.broadcast %cst_39 : f32 to vector<16x256xf32>
    %62 = arith.mulf %61, %60 : vector<16x256xf32>
    %63 = math.tanh %62 : vector<16x256xf32>
    %cst_40 = arith.constant 1.000000e+00 : f32
    %64 = vector.broadcast %cst_40 : f32 to vector<16x256xf32>
    %65 = arith.addf %63, %64 : vector<16x256xf32>
    %cst_41 = arith.constant 5.000000e-01 : f32
    %66 = vector.broadcast %cst_41 : f32 to vector<16x256xf32>
    %67 = arith.mulf %66, %65 : vector<16x256xf32>
    %68 = arith.truncf %67 : vector<16x256xf32> to vector<16x256xbf16>
    %c0_42 = arith.constant 0 : index
    %c0_43 = arith.constant 0 : index
    %69 = vector.load %arg15[%c0_42, %c0_43] : memref<16x256xbf16, #tpu.memory_space<vmem>>, vector<16x256xbf16>
    tpu.vector_store %arg15[%c0_42, %c0_43], %68 {strides = array<i32>} : memref<16x256xbf16, #tpu.memory_space<vmem>>, vector<16x256xbf16>,
    %cst_44 = arith.constant 9.99999993E-9 : f32
    %70 = vector.broadcast %cst_44 : f32 to vector<16x32xf32>
    %71 = arith.addf %32, %70 : vector<16x32xf32>
    %72 = math.log %71 : vector<16x32xf32>
    %cst_45 = arith.constant 1.000000e+00 : f32
    %73 = vector.broadcast %cst_45 : f32 to vector<16x32xf32>
    %74 = arith.addf %73, %72 : vector<16x32xf32>
    %75 = arith.mulf %23, %23 : vector<16x32xf32>
    %76 = arith.subf %74, %75 : vector<16x32xf32>
    %77 = arith.subf %76, %32 : vector<16x32xf32>
    %cst_46 = arith.constant dense<0.000000e+00> : vector<16xf32>
    %78 = vector.multi_reduction <add>, %77, %cst_46 [1] : vector<16x32xf32> to vector<16xf32>
    %79 = vector.shape_cast %78 : vector<16xf32> to vector<16x1xf32>
    %cst_47 = arith.constant 5.000000e-01 : f32
    %80 = vector.broadcast %cst_47 : f32 to vector<16x1xf32>
    %81 = arith.mulf %80, %79 : vector<16x1xf32>
    %82 = arith.mulf %0, %60 : vector<16x256xf32>
    %cst_48 = arith.constant 0.000000e+00 : f32
    %83 = vector.broadcast %cst_48 : f32 to vector<16x256xf32>
    %84 = arith.maximumf %60, %83 : vector<16x256xf32>
    %85 = math.absf %60 : vector<16x256xf32>
    %cst_49 = arith.constant 0.000000e+00 : f32
    %86 = vector.broadcast %cst_49 : f32 to vector<16x256xf32>
    %87 = arith.subf %86, %85 : vector<16x256xf32>
    %88 = math.exp %87 : vector<16x256xf32>
    %89 = math.log1p %88 : vector<16x256xf32>
    %90 = arith.addf %84, %89 : vector<16x256xf32>
    %91 = arith.subf %82, %90 : vector<16x256xf32>
    %cst_50 = arith.constant dense<0.000000e+00> : vector<16xf32>
    %92 = vector.multi_reduction <add>, %91, %cst_50 [1] : vector<16x256xf32> to vector<16xf32>
    %93 = vector.shape_cast %92 : vector<16xf32> to vector<16x1xf32>
    %94 = arith.addf %81, %93 : vector<16x1xf32>
    %c16_i32 = arith.constant 16 : i32
    %95 = arith.muli %arg0, %c16_i32 : i32
    %96 = tpu.iota {dimensions = array<i32: 0>} : vector<16x1xi32>
    %97 = vector.broadcast %95 : i32 to vector<16x1xi32>
    %98 = arith.addi %97, %96 : vector<16x1xi32>
    %c2_i32 = arith.constant 2 : i32
    %99 = vector.broadcast %c2_i32 : i32 to vector<16x1xi32>
    %100 = arith.cmpi slt, %98, %99 : vector<16x1xi32>
    %cst_51 = arith.constant 0.000000e+00 : f32
    %101 = vector.broadcast %cst_51 : f32 to vector<16x1xf32>
    %102 = arith.select %100, %94, %101 : vector<16x1xi1>, vector<16x1xf32>
    %103 = vector.shape_cast %102 : vector<16x1xf32> to vector<1x16x1xf32>
    %cst_52 = arith.constant dense<0.000000e+00> : vector<1xf32>
    %104 = vector.multi_reduction <add>, %103, %cst_52 [1, 2] : vector<1x16x1xf32> to vector<1xf32>
    %105 = vector.shape_cast %104 : vector<1xf32> to vector<1x1x1xf32>
    %106 = vector.extract %105[0, 0, 0] : f32 from vector<1x1x1xf32>
    %c0_53 = arith.constant 0 : index
    %c0_54 = arith.constant 0 : index
    %107 = memref.load %arg16[%c0_53, %c0_54] : memref<1x1xf32, #tpu.memory_space<smem>>
    memref.store %106, %arg16[%c0_53, %c0_54] : memref<1x1xf32, #tpu.memory_space<smem>>
    return
  }
  func.func @transform_0(%arg0: i32) -> (i32, i32) {
    %c0_i32 = arith.constant 0 : i32
    %c0_i32_0 = arith.constant 0 : i32
    return %arg0, %c0_i32 : i32, i32
  }
  func.func @transform_1(%arg0: i32) -> (i32, i32) {
    %c0_i32 = arith.constant 0 : i32
    %c0_i32_0 = arith.constant 0 : i32
    return %arg0, %c0_i32 : i32, i32
  }
  func.func @transform_2(%arg0: i32) -> (i32, i32) {
    %c0_i32 = arith.constant 0 : i32
    %c0_i32_0 = arith.constant 0 : i32
    %c0_i32_1 = arith.constant 0 : i32
    return %c0_i32, %c0_i32_0 : i32, i32
  }
  func.func @transform_3(%arg0: i32) -> (i32, i32) {
    %c0_i32 = arith.constant 0 : i32
    %c0_i32_0 = arith.constant 0 : i32
    %c0_i32_1 = arith.constant 0 : i32
    return %c0_i32, %c0_i32_0 : i32, i32
  }
  func.func @transform_4(%arg0: i32) -> (i32, i32) {
    %c0_i32 = arith.constant 0 : i32
    %c0_i32_0 = arith.constant 0 : i32
    %c0_i32_1 = arith.constant 0 : i32
    return %c0_i32, %c0_i32_0 : i32, i32
  }
  func.func @transform_5(%arg0: i32) -> (i32, i32) {
    %c0_i32 = arith.constant 0 : i32
    %c0_i32_0 = arith.constant 0 : i32
    %c0_i32_1 = arith.constant 0 : i32
    return %c0_i32, %c0_i32_0 : i32, i32
  }
  func.func @transform_6(%arg0: i32) -> (i32, i32) {
    %c0_i32 = arith.constant 0 : i32
    %c0_i32_0 = arith.constant 0 : i32
    %c0_i32_1 = arith.constant 0 : i32
    return %c0_i32, %c0_i32_0 : i32, i32
  }
  func.func @transform_7(%arg0: i32) -> (i32, i32) {
    %c0_i32 = arith.constant 0 : i32
    %c0_i32_0 = arith.constant 0 : i32
    %c0_i32_1 = arith.constant 0 : i32
    return %c0_i32, %c0_i32_0 : i32, i32
  }
  func.func @transform_8(%arg0: i32) -> (i32, i32) {
    %c0_i32 = arith.constant 0 : i32
    %c0_i32_0 = arith.constant 0 : i32
    %c0_i32_1 = arith.constant 0 : i32
    return %c0_i32, %c0_i32_0 : i32, i32
  }
  func.func @transform_9(%arg0: i32) -> (i32, i32) {
    %c0_i32 = arith.constant 0 : i32
    %c0_i32_0 = arith.constant 0 : i32
    %c0_i32_1 = arith.constant 0 : i32
    return %c0_i32, %c0_i32_0 : i32, i32
  }
  func.func @transform_10(%arg0: i32) -> (i32, i32) {
    %c0_i32 = arith.constant 0 : i32
    %c0_i32_0 = arith.constant 0 : i32
    %c0_i32_1 = arith.constant 0 : i32
    return %c0_i32, %c0_i32_0 : i32, i32
  }
  func.func @transform_11(%arg0: i32) -> (i32, i32) {
    %c0_i32 = arith.constant 0 : i32
    %c0_i32_0 = arith.constant 0 : i32
    %c0_i32_1 = arith.constant 0 : i32
    return %c0_i32, %c0_i32_0 : i32, i32
  }
  func.func @transform_12(%arg0: i32) -> (i32, i32) {
    %c0_i32 = arith.constant 0 : i32
    %c0_i32_0 = arith.constant 0 : i32
    %c0_i32_1 = arith.constant 0 : i32
    return %c0_i32, %c0_i32_0 : i32, i32
  }
  func.func @transform_13(%arg0: i32) -> (i32, i32) {
    %c0_i32 = arith.constant 0 : i32
    %c0_i32_0 = arith.constant 0 : i32
    %c0_i32_1 = arith.constant 0 : i32
    return %c0_i32, %c0_i32_0 : i32, i32
  }
  func.func @transform_14(%arg0: i32) -> (i32, i32) {
    %c0_i32 = arith.constant 0 : i32
    %c0_i32_0 = arith.constant 0 : i32
    return %arg0, %c0_i32 : i32, i32
  }
  func.func @transform_15(%arg0: i32) -> (i32, i32) {
    %c0_i32 = arith.constant 0 : i32
    %c0_i32_0 = arith.constant 0 : i32
    return %arg0, %c0_i32 : i32, i32
  }
}

</mosaic_0001>

<bundles_post_ra>
// kernel: tpu_custom_call.1
= control target key start
LH: loop header
LB: loop body
LE: loop exit
PB: predicated region body
PF: predicated region fallthrough
CT: control target
= control target key end

     0   :  { %s2966_s0 = inlined_call_operand.hbm [shape: f32[16,256], index: 0, kind: input, shape index: {}]   ;;  %s2967_s1 = inlined_call_operand.hbm [shape: f32[16,32], index: 1, kind: input, shape index: {}]   ;;  %s2968_s2 = inlined_call_operand.hbm [shape: bf16[256,256], index: 2, kind: input, shape index: {}]   ;;  %s2969_s3 = inlined_call_operand.hbm [shape: f32[1,256], index: 3, kind: input, shape index: {}]   ;;  %s2970_s4 = inlined_call_operand.hbm [shape: bf16[256,256], index: 4, kind: input, shape index: {}]   ;;  %s2971_s5 = inlined_call_operand.hbm [shape: f32[1,256], index: 5, kind: input, shape index: {}]   ;;  %s2972_s6 = inlined_call_operand.hbm [shape: bf16[256,64], index: 6, kind: input, shape index: {}]   ;;  %s2973_s7 = inlined_call_operand.hbm [shape: f32[1,64], index: 7, kind: input, shape index: {}]   ;;  %s2974_s8 = inlined_call_operand.hbm [shape: bf16[32,256], index: 8, kind: input, shape index: {}]   ;;  %s2975_s9 = inlined_call_operand.hbm [shape: f32[1,256], index: 9, kind: input, shape index: {}]   ;;  %s2976_s10 = inlined_call_operand.hbm [shape: bf16[256,256], index: 10, kind: input, shape index: {}]   ;;  %s2977_s11 = inlined_call_operand.hbm [shape: f32[1,256], index: 11, kind: input, shape index: {}]   ;;  %s2978_s12 = inlined_call_operand.hbm [shape: bf16[256,256], index: 12, kind: input, shape index: {}]   ;;  %s2979_s13 = inlined_call_operand.hbm [shape: f32[1,256], index: 13, kind: input, shape index: {}]   ;;  %s2980_s14 = inlined_call_operand.hbm [shape: bf16[16,256], index: 14, kind: output, shape index: {0}]   ;;  %s2981_s15 = inlined_call_operand.hbm [shape: f32[1,1], index: 15, kind: output, shape index: {1}]  }
   0x1   :  { %2983 = sst [smem:[#allocation38_spill]] %s2981_s15 }
   0x2   :  { %21 = vsyncpa [#allocation3], 0 }
   0x3   :  { %22 = vsyncpa [#allocation7], 0 }
   0x4   :  { %23 = vsyncpa [#allocation10], 0 }
   0x5   :  { %24 = vsyncpa [#allocation13], 0 }
   0x6   :  { %25 = vsyncpa [#allocation16], 0 }
   0x7   :  { %26 = vsyncpa [#allocation19], 0 }
   0x8   :  { %27 = vsyncpa [#allocation22], 0 }
   0x9   :  { %28 = vsyncpa [#allocation25], 0 }
   0xa   :  { %29 = vsyncpa [#allocation4], 0 }
   0xb   :  { %30 = vsyncpa [#allocation5], 0  ;;  %s2589_s18 = smov [#allocation6]   ;;  %s2229_s22 = scalar_lea.hbm %s2967_s1, 256 }
   0xc   :  { %s48_s19 = sshll.u32 %s2589_s18, 4  ;;  %p2230_p0 = scmp.ne.s32.totalorder %s2967_s1, %s2229_s22  ;;  %s49_s19 = int_to_ptr.vmem [resolvable:$true] %s48_s19 }
   0xd   :  { %p2233_p1 = scmp.lt.u32.totalorder %s2229_s22, %s2967_s1 }
   0xf   :  { %p2235_p2 = pnand %p2233_p1, %p2230_p0 }
  0x11   :  { %2238 = shalt.err (!%p2235_p2)
}
  0x12   :  { %s2239_s27 = scalar_lea.vmem %s49_s19, 256  ;;  %p2244_p4 = scmp.lt.s32.totalorder %s49_s19, %s49_s19 }
  0x13   :  { %p2240_p3 = scmp.ne.s32.totalorder %s49_s19, %s2239_s27  ;;  %p2245_p5 = scmp.lt.s32.totalorder %s2239_s27, %s2239_s27 }
  0x15   :  { %p2246_p6 = por %p2245_p5, %p2244_p4 }
  0x17   :  { %p2247_p7 = pnand %p2246_p6, %p2240_p3 }
  0x19   :  { %2250 = shalt.err (!%p2247_p7)
}
  0x1a   :  { %s2590_s28 = smov 128   ;;  %s2591_s29 = smov 8  }
  0x1b   :  { %54 = dma.hbm_to_vmem [thread:$0]  %s2967_s1, 256, %s49_s19, [#allocation7], %s2590_s28, %s2590_s28, %s2591_s29  }
  0x1c   :  { %s2592_s17 = smov [#allocation9]   ;;  %s2593_s20 = smov [#allocation12]  }
  0x1d   :  { %s73_s18 = sshll.u32 %s2592_s17, 4  ;;  %s95_s21 = sshll.u32 %s2593_s20, 4  ;;  %s74_s18 = int_to_ptr.vmem [resolvable:$true] %s73_s18  ;;  %s96_s21 = int_to_ptr.vmem [resolvable:$true] %s95_s21 }
  0x1e   :  { %s2251_s24 = scalar_lea.hbm %s2969_s3, 32 }
  0x1f   :  { %p2252_p8 = scmp.ne.s32.totalorder %s2969_s3, %s2251_s24  ;;  %p2255_p9 = scmp.lt.u32.totalorder %s2251_s24, %s2969_s3 }
  0x21   :  { %p2257_p10 = pnand %p2255_p9, %p2252_p8 }
  0x23   :  { %2260 = shalt.err (!%p2257_p10)
}
  0x24   :  { %s2261_s1 = scalar_lea.vmem %s74_s18, 32  ;;  %p2266_p12 = scmp.lt.s32.totalorder %s74_s18, %s74_s18 }
  0x25   :  { %p2262_p11 = scmp.ne.s32.totalorder %s74_s18, %s2261_s1  ;;  %p2267_p13 = scmp.lt.s32.totalorder %s2261_s1, %s2261_s1 }
  0x27   :  { %p2268_p0 = por %p2267_p13, %p2266_p12 }
  0x29   :  { %p2269_p1 = pnand %p2268_p0, %p2262_p11 }
  0x2b   :  { %2272 = shalt.err (!%p2269_p1)
}
  0x2c   :  { %76 = dma.hbm_to_vmem [thread:$0]  %s2969_s3, 32, %s74_s18, [#allocation10]  }
  0x2d   :  { %s2273_s20 = scalar_lea.hbm %s2971_s5, 32 }
  0x2e   :  { %p2274_p2 = scmp.ne.s32.totalorder %s2971_s5, %s2273_s20  ;;  %p2277_p3 = scmp.lt.u32.totalorder %s2273_s20, %s2971_s5 }
  0x30   :  { %p2279_p4 = pnand %p2277_p3, %p2274_p2 }
  0x32   :  { %2282 = shalt.err (!%p2279_p4)
}
  0x33   :  { %s2283_s25 = scalar_lea.vmem %s96_s21, 32  ;;  %p2288_p6 = scmp.lt.s32.totalorder %s96_s21, %s96_s21 }
  0x34   :  { %p2284_p5 = scmp.ne.s32.totalorder %s96_s21, %s2283_s25  ;;  %p2289_p7 = scmp.lt.s32.totalorder %s2283_s25, %s2283_s25 }
  0x36   :  { %p2290_p8 = por %p2289_p7, %p2288_p6 }
  0x38   :  { %p2291_p9 = pnand %p2290_p8, %p2284_p5 }
  0x3a   :  { %2294 = shalt.err (!%p2291_p9)
}
  0x3b   :  { %98 = dma.hbm_to_vmem [thread:$0]  %s2971_s5, 32, %s96_s21, [#allocation13]  }
  0x3c   :  { %s2594_s26 = smov [#allocation15]   ;;  %s2595_s1 = smov [#allocation18]  }
  0x3d   :  { %s117_s27 = sshll.u32 %s2594_s26, 4  ;;  %s139_s19 = sshll.u32 %s2595_s1, 4  ;;  %s118_s27 = int_to_ptr.vmem [resolvable:$true] %s117_s27  ;;  %s140_s19 = int_to_ptr.vmem [resolvable:$true] %s139_s19 }
  0x3e   :  { %s2295_s17 = scalar_lea.hbm %s2973_s7, 16 }
  0x3f   :  { %p2296_p10 = scmp.ne.s32.totalorder %s2973_s7, %s2295_s17  ;;  %p2299_p11 = scmp.lt.u32.totalorder %s2295_s17, %s2973_s7 }
  0x41   :  { %p2301_p12 = pnand %p2299_p11, %p2296_p10 }
  0x43   :  { %2304 = shalt.err (!%p2301_p12)
}
  0x44   :  { %s2305_s5 = scalar_lea.vmem %s118_s27, 16  ;;  %s2309_s21 = scalar_lea.vmem %s118_s27, 32 }
  0x45   :  { %p2306_p13 = scmp.ne.s32.totalorder %s118_s27, %s2305_s5  ;;  %p2310_p0 = scmp.lt.s32.totalorder %s118_s27, %s118_s27 }
  0x46   :  { %p2311_p1 = scmp.lt.s32.totalorder %s2309_s21, %s2305_s5 }
  0x48   :  { %p2312_p2 = por %p2311_p1, %p2310_p0 }
  0x4a   :  { %p2313_p3 = pnand %p2312_p2, %p2306_p13 }
  0x4c   :  { %2316 = shalt.err (!%p2313_p3)
}
  0x4d   :  { %120 = dma.hbm_to_vmem [thread:$0]  %s2973_s7, 16, %s118_s27, [#allocation16]  }
  0x4e   :  { %s2317_s26 = scalar_lea.hbm %s2975_s9, 32 }
  0x4f   :  { %p2318_p4 = scmp.ne.s32.totalorder %s2975_s9, %s2317_s26  ;;  %p2321_p5 = scmp.lt.u32.totalorder %s2317_s26, %s2975_s9 }
  0x51   :  { %p2323_p6 = pnand %p2321_p5, %p2318_p4 }
  0x53   :  { %2326 = shalt.err (!%p2323_p6)
}
  0x54   :  { %s2327_s20 = scalar_lea.vmem %s140_s19, 32  ;;  %p2332_p8 = scmp.lt.s32.totalorder %s140_s19, %s140_s19 }
  0x55   :  { %p2328_p7 = scmp.ne.s32.totalorder %s140_s19, %s2327_s20  ;;  %p2333_p9 = scmp.lt.s32.totalorder %s2327_s20, %s2327_s20 }
  0x57   :  { %p2334_p10 = por %p2333_p9, %p2332_p8 }
  0x59   :  { %p2335_p11 = pnand %p2334_p10, %p2328_p7 }
  0x5b   :  { %2338 = shalt.err (!%p2335_p11)
}
  0x5c   :  { %142 = dma.hbm_to_vmem [thread:$0]  %s2975_s9, 32, %s140_s19, [#allocation19]  }
  0x5d   :  { %s2596_s15 = smov [#allocation21]   ;;  %s2597_s23 = smov [#allocation2]  }
  0x5e   :  { %s161_s22 = sshll.u32 %s2596_s15, 4  ;;  %s36_s5 = sshll.u32 %s2597_s23, 4  ;;  %s162_s22 = int_to_ptr.vmem [resolvable:$true] %s161_s22  ;;  %s37_s5 = int_to_ptr.vmem [resolvable:$true] %s36_s5 }
  0x5f   :  { %s2339_s25 = scalar_lea.hbm %s2977_s11, 32 }
  0x60   :  { %p2340_p12 = scmp.ne.s32.totalorder %s2977_s11, %s2339_s25  ;;  %p2343_p13 = scmp.lt.u32.totalorder %s2339_s25, %s2977_s11 }
  0x62   :  { %p2345_p0 = pnand %p2343_p13, %p2340_p12 }
  0x64   :  { %2348 = shalt.err (!%p2345_p0)
}
  0x65   :  { %s2349_s9 = scalar_lea.vmem %s162_s22, 32  ;;  %p2354_p2 = scmp.lt.s32.totalorder %s162_s22, %s162_s22 }
  0x66   :  { %p2350_p1 = scmp.ne.s32.totalorder %s162_s22, %s2349_s9  ;;  %p2355_p3 = scmp.lt.s32.totalorder %s2349_s9, %s2349_s9 }
  0x68   :  { %p2356_p4 = por %p2355_p3, %p2354_p2 }
  0x6a   :  { %p2357_p5 = pnand %p2356_p4, %p2350_p1 }
  0x6c   :  { %2360 = shalt.err (!%p2357_p5)
}
  0x6d   :  { %164 = dma.hbm_to_vmem [thread:$0]  %s2977_s11, 32, %s162_s22, [#allocation22]  }
  0x6e   :  { %s2361_s20 = scalar_lea.hbm %s2966_s0, 512 }
  0x6f   :  { %p2362_p6 = scmp.ne.s32.totalorder %s2966_s0, %s2361_s20  ;;  %p2365_p7 = scmp.lt.u32.totalorder %s2361_s20, %s2966_s0 }
  0x71   :  { %p2367_p8 = pnand %p2365_p7, %p2362_p6 }
  0x73   :  { %2370 = shalt.err (!%p2367_p8)
}
  0x74   :  { %s2371_s21 = scalar_lea.vmem %s37_s5, 512  ;;  %p2376_p10 = scmp.lt.s32.totalorder %s37_s5, %s37_s5 }
  0x75   :  { %p2372_p9 = scmp.ne.s32.totalorder %s37_s5, %s2371_s21  ;;  %p2377_p11 = scmp.lt.s32.totalorder %s2371_s21, %s2371_s21 }
  0x77   :  { %p2378_p12 = por %p2377_p11, %p2376_p10 }
  0x79   :  { %p2379_p13 = pnand %p2378_p12, %p2372_p9 }
  0x7b   :  { %2382 = shalt.err (!%p2379_p13)
}
  0x7c   :  { %s2598_s11 = smov 256   ;;  %s2599_s22 = smov 16  }
  0x7d   :  { %42 = dma.hbm_to_vmem [thread:$0]  %s2966_s0, 512, %s37_s5, [#allocation3], %s2598_s11, %s2598_s11, %s2599_s22  }
  0x7e   :  { %s2600_s3 = smov [#allocation8]   ;;  %s2601_s26 = smov [#allocation11]  }
  0x7f   :  { %s60_s18 = sshll.u32 %s2600_s3, 4  ;;  %s82_s1 = sshll.u32 %s2601_s26, 4  ;;  %s61_s18 = int_to_ptr.vmem [resolvable:$true] %s60_s18  ;;  %s83_s1 = int_to_ptr.vmem [resolvable:$true] %s82_s1 }
  0x80   :  { %s2383_s30 = scalar_lea.hbm %s2968_s2, 4096 }
  0x81   :  { %p2384_p0 = scmp.ne.s32.totalorder %s2968_s2, %s2383_s30  ;;  %p2387_p1 = scmp.lt.u32.totalorder %s2383_s30, %s2968_s2 }
  0x83   :  { %p2389_p2 = pnand %p2387_p1, %p2384_p0 }
  0x85   :  { %2392 = shalt.err (!%p2389_p2)
}
  0x86   :  { %s2393_s0 = scalar_lea.vmem %s61_s18, 4096  ;;  %p2398_p4 = scmp.lt.s32.totalorder %s61_s18, %s61_s18 }
  0x87   :  { %p2394_p3 = scmp.ne.s32.totalorder %s61_s18, %s2393_s0  ;;  %p2399_p5 = scmp.lt.s32.totalorder %s2393_s0, %s2393_s0 }
  0x89   :  { %p2400_p6 = por %p2399_p5, %p2398_p4 }
  0x8b   :  { %p2401_p7 = pnand %p2400_p6, %p2394_p3 }
  0x8d   :  { %2404 = shalt.err (!%p2401_p7)
}
  0x8e   :  { %66 = dma.hbm_to_vmem [thread:$0]  %s2968_s2, 4096, %s61_s18, [#allocation7], %s2590_s28, %s2590_s28, %s2591_s29  }
  0x8f   :  { %s2405_s21 = scalar_lea.hbm %s2970_s4, 4096 }
  0x90   :  { %p2406_p8 = scmp.ne.s32.totalorder %s2970_s4, %s2405_s21  ;;  %p2409_p9 = scmp.lt.u32.totalorder %s2405_s21, %s2970_s4 }
  0x92   :  { %p2411_p10 = pnand %p2409_p9, %p2406_p8 }
  0x94   :  { %2414 = shalt.err (!%p2411_p10)
}
  0x95   :  { %s2415_s3 = scalar_lea.vmem %s83_s1, 4096  ;;  %p2420_p12 = scmp.lt.s32.totalorder %s83_s1, %s83_s1 }
  0x96   :  { %p2416_p11 = scmp.ne.s32.totalorder %s83_s1, %s2415_s3  ;;  %p2421_p13 = scmp.lt.s32.totalorder %s2415_s3, %s2415_s3 }
  0x98   :  { %p2422_p0 = por %p2421_p13, %p2420_p12 }
  0x9a   :  { %p2423_p1 = pnand %p2422_p0, %p2416_p11 }
  0x9c   :  { %2426 = shalt.err (!%p2423_p1)
}
  0x9d   :  { %88 = dma.hbm_to_vmem [thread:$0]  %s2970_s4, 4096, %s83_s1, [#allocation10], %s2590_s28, %s2590_s28, %s2591_s29  }
  0x9e   :  { %s2602_s26 = smov [#allocation14]   ;;  %s2427_s16 = scalar_lea.hbm %s2972_s6, 2048 }
  0x9f   :  { %s104_s9 = sshll.u32 %s2602_s26, 4  ;;  %p2428_p2 = scmp.ne.s32.totalorder %s2972_s6, %s2427_s16  ;;  %s105_s9 = int_to_ptr.vmem [resolvable:$true] %s104_s9 }
  0xa0   :  { %p2431_p3 = scmp.lt.u32.totalorder %s2427_s16, %s2972_s6 }
  0xa2   :  { %p2433_p4 = pnand %p2431_p3, %p2428_p2 }
  0xa4   :  { %2436 = shalt.err (!%p2433_p4)
}
  0xa5   :  { %s2437_s5 = scalar_lea.vmem %s105_s9, 2048  ;;  %p2442_p6 = scmp.lt.s32.totalorder %s105_s9, %s105_s9 }
  0xa6   :  { %p2438_p5 = scmp.ne.s32.totalorder %s105_s9, %s2437_s5  ;;  %p2443_p7 = scmp.lt.s32.totalorder %s2437_s5, %s2437_s5 }
  0xa8   :  { %p2444_p8 = por %p2443_p7, %p2442_p6 }
  0xaa   :  { %p2445_p9 = pnand %p2444_p8, %p2438_p5 }
  0xac   :  { %2448 = shalt.err (!%p2445_p9)
}
  0xad   :  { %s2603_s4 = smov 64   ;;  %s2604_s1 = smov 4  }
  0xae   :  { %110 = dma.hbm_to_vmem [thread:$0]  %s2972_s6, 2048, %s105_s9, [#allocation13], %s2603_s4, %s2603_s4, %s2604_s1  }
  0xaf   :  { %s2605_s23 = smov [#allocation17]   ;;  %s2606_s11 = smov [#allocation20]  }
  0xb0   :  { %s126_s21 = sshll.u32 %s2605_s23, 4  ;;  %s148_s22 = sshll.u32 %s2606_s11, 4  ;;  %s127_s21 = int_to_ptr.vmem [resolvable:$true] %s126_s21  ;;  %s2823_s22 = int_to_ptr.vmem [resolvable:$true] %s148_s22 }
  0xb1   :  { %s2449_s3 = scalar_lea.hbm %s2974_s8, 512 }
  0xb2   :  { %p2450_p10 = scmp.ne.s32.totalorder %s2974_s8, %s2449_s3  ;;  %p2453_p11 = scmp.lt.u32.totalorder %s2449_s3, %s2974_s8 }
  0xb4   :  { %p2455_p12 = pnand %p2453_p11, %p2450_p10 }
  0xb6   :  { %2458 = shalt.err (!%p2455_p12)
}
  0xb7   :  { %s2459_s6 = scalar_lea.vmem %s127_s21, 512  ;;  %p2464_p0 = scmp.lt.s32.totalorder %s127_s21, %s127_s21 }
  0xb8   :  { %p2460_p13 = scmp.ne.s32.totalorder %s127_s21, %s2459_s6  ;;  %p2465_p1 = scmp.lt.s32.totalorder %s2459_s6, %s2459_s6 }
  0xba   :  { %p2466_p2 = por %p2465_p1, %p2464_p0 }
  0xbc   :  { %p2467_p3 = pnand %p2466_p2, %p2460_p13 }
  0xbe   :  { %2470 = shalt.err (!%p2467_p3)
}
  0xbf   :  { %132 = dma.hbm_to_vmem [thread:$0]  %s2974_s8, 512, %s127_s21, [#allocation16], %s2590_s28, %s2590_s28, %s2591_s29  }
  0xc0   :  { %s2471_s20 = scalar_lea.hbm %s2976_s10, 4096 }
  0xc1   :  { %p2472_p4 = scmp.ne.s32.totalorder %s2976_s10, %s2471_s20  ;;  %p2475_p5 = scmp.lt.u32.totalorder %s2471_s20, %s2976_s10 }
  0xc3   :  { %p2477_p6 = pnand %p2475_p5, %p2472_p4 }
  0xc5   :  { %2480 = shalt.err (!%p2477_p6)
}
  0xc6   :  { %s2481_s1 = scalar_lea.vmem %s2823_s22, 4096  ;;  %p2486_p8 = scmp.lt.s32.totalorder %s2823_s22, %s2823_s22 }
  0xc7   :  { %p2482_p7 = scmp.ne.s32.totalorder %s2823_s22, %s2481_s1  ;;  %p2487_p9 = scmp.lt.s32.totalorder %s2481_s1, %s2481_s1 }
  0xc9   :  { %p2488_p10 = por %p2487_p9, %p2486_p8 }
  0xcb   :  { %p2489_p11 = pnand %p2488_p10, %p2482_p7 }
  0xcd   :  { %2492 = shalt.err (!%p2489_p11)
}
  0xce   :  { %154 = dma.hbm_to_vmem [thread:$0]  %s2976_s10, 4096, %s2823_s22, [#allocation19], %s2590_s28, %s2590_s28, %s2591_s29  }
  0xcf   :  { %s2607_s15 = smov [#allocation23]   ;;  %s2608_s21 = smov [#allocation24]  }
  0xd0   :  { %s170_s23 = sshll.u32 %s2607_s15, 4  ;;  %s183_s11 = sshll.u32 %s2608_s21, 4  ;;  %s171_s23 = int_to_ptr.vmem [resolvable:$true] %s170_s23  ;;  %s184_s11 = int_to_ptr.vmem [resolvable:$true] %s183_s11 }
  0xd1   :  { %s2493_s3 = scalar_lea.hbm %s2978_s12, 4096 }
  0xd2   :  { %p2494_p12 = scmp.ne.s32.totalorder %s2978_s12, %s2493_s3  ;;  %p2497_p13 = scmp.lt.u32.totalorder %s2493_s3, %s2978_s12 }
  0xd4   :  { %p2499_p0 = pnand %p2497_p13, %p2494_p12 }
  0xd6   :  { %2502 = shalt.err (!%p2499_p0)
}
  0xd7   :  { %s2503_s10 = scalar_lea.vmem %s171_s23, 4096  ;;  %p2508_p2 = scmp.lt.s32.totalorder %s171_s23, %s171_s23 }
  0xd8   :  { %p2504_p1 = scmp.ne.s32.totalorder %s171_s23, %s2503_s10  ;;  %p2509_p3 = scmp.lt.s32.totalorder %s2503_s10, %s2503_s10 }
  0xda   :  { %p2510_p4 = por %p2509_p3, %p2508_p2 }
  0xdc   :  { %p2511_p5 = pnand %p2510_p4, %p2504_p1 }
  0xde   :  { %2514 = shalt.err (!%p2511_p5)
}
  0xdf   :  { %176 = dma.hbm_to_vmem [thread:$0]  %s2978_s12, 4096, %s171_s23, [#allocation22], %s2590_s28, %s2590_s28, %s2591_s29  }
  0xe0   :  { %s2515_s16 = scalar_lea.hbm %s2979_s13, 32 }
  0xe1   :  { %p2516_p6 = scmp.ne.s32.totalorder %s2979_s13, %s2515_s16  ;;  %p2519_p7 = scmp.lt.u32.totalorder %s2515_s16, %s2979_s13 }
  0xe3   :  { %p2521_p8 = pnand %p2519_p7, %p2516_p6 }
  0xe5   :  { %2524 = shalt.err (!%p2521_p8)
}
  0xe6   :  { %s2525_s5 = scalar_lea.vmem %s184_s11, 32  ;;  %p2530_p10 = scmp.lt.s32.totalorder %s184_s11, %s184_s11 }
  0xe7   :  { %p2526_p9 = scmp.ne.s32.totalorder %s184_s11, %s2525_s5  ;;  %p2531_p11 = scmp.lt.s32.totalorder %s2525_s5, %s2525_s5 }
  0xe9   :  { %p2532_p12 = por %p2531_p11, %p2530_p10 }
  0xeb   :  { %p2533_p13 = pnand %p2532_p12, %p2526_p9 }
  0xed   :  { %2536 = shalt.err (!%p2533_p13)
}
  0xee   :  { %186 = dma.hbm_to_vmem [thread:$0]  %s2979_s13, 32, %s184_s11, [#allocation25]  }
  0xef   :  { %2569 = dma.done.wait [#allocation3], 512  }
  0xf0   :  { %2570 = vsyncadd [#allocation3], 4294966784 }
  0xf1   :  { %2571 = dma.done.wait [#allocation7], 4352  }
  0xf2   :  { %2572 = vsyncadd [#allocation7], 4294962944 }
  0xf3   :  { %2573 = dma.done.wait [#allocation10], 4128  }
  0xf4   :  { %2574 = vsyncadd [#allocation10], 4294963168 }
  0xf5   :  { %2575 = dma.done.wait [#allocation13], 2080  }
  0xf6   :  { %2576 = vsyncadd [#allocation13], 4294965216 }
  0xf7   :  { %2577 = dma.done.wait [#allocation16], 528  }
  0xf8   :  { %2578 = vsyncadd [#allocation16], 4294966768 }
  0xf9   :  { %2579 = dma.done.wait [#allocation19], 4128  }
  0xfa   :  { %2580 = vsyncadd [#allocation19], 4294963168 }
  0xfb   :  { %2581 = dma.done.wait [#allocation22], 4128  }
  0xfc   :  { %2582 = vsyncadd [#allocation22], 4294963168 }
  0xfd   :  { %2583 = dma.done.wait [#allocation25], 32  }
  0xfe   :  { %2584 = vsyncadd [#allocation25], 4294967264  ;;  %v1984_v0 = vld [vmem:[#allocation8 + $0x4] ss:$8 sps:$4 sm:$0xff]   ;;  %v1986_v1 = vld [vmem:[#allocation8] ss:$8 sps:$4 sm:$0xff]  }
  0xff   :  { %440 = vmatprep.subr.bf16.mxu0 %v1984_v0  ;;  %v1987_v2 = vld [vmem:[#allocation8 + $0x14] ss:$8 sps:$4 sm:$0xff]   ;;  %v1989_v3 = vld [vmem:[#allocation8 + $0x10] ss:$8 sps:$4 sm:$0xff]   ;;  %v1990_v4 = vld [vmem:[#allocation8 + $0x24] ss:$8 sps:$4 sm:$0xff]  }
 0x100   :  { %441 = vmatpush1.bf16.msra.mxu0 %v1986_v1  ;;  %v1992_v5 = vld [vmem:[#allocation8 + $0x20] ss:$8 sps:$4 sm:$0xff]   ;;  %v1993_v6 = vld [vmem:[#allocation8 + $0x34] ss:$8 sps:$4 sm:$0xff]   ;;  %v1995_v7 = vld [vmem:[#allocation8 + $0x30] ss:$8 sps:$4 sm:$0xff]  }
 0x101   :  { %442 = vmatprep.subr.bf16.mxu0 %v1987_v2  ;;  %v1996_v8 = vld [vmem:[#allocation8 + $0x44] ss:$8 sps:$4 sm:$0xff]   ;;  %v1998_v9 = vld [vmem:[#allocation8 + $0x40] ss:$8 sps:$4 sm:$0xff]   ;;  %v1999_v10 = vld [vmem:[#allocation8 + $0x54] ss:$8 sps:$4 sm:$0xff]  }
 0x102   :  { %v2001_v11 = vld [vmem:[#allocation8 + $0x50] ss:$8 sps:$4 sm:$0xff]   ;;  %v2002_v12 = vld [vmem:[#allocation8 + $0x64] ss:$8 sps:$4 sm:$0xff]   ;;  %v2004_v15 = vld [vmem:[#allocation8 + $0x60] ss:$8 sps:$4 sm:$0xff]  }
 0x103   :  { %v231_v13 = vld [vmem:[#allocation2 + $0x8] sm:$0xff]  ;;  %v233_v14 = vld [vmem:[#allocation2 + $0x18] sm:$0xff]  ;;  %v2887_v55 = vld [vmem:[#allocation2] sm:$0xff]  ;;  %s2609_s13 = smov 32   ;;  %s2611_s1 = smov 96   ;;  %vm1023_vm6 = vcmask 261120  }
 0x104   :  { %443 = vmatpush1.bf16.msra.mxu0 %v1989_v3  ;;  %v2005_v16 = vld [vmem:[#allocation8 + $0x74] ss:$8 sps:$4 sm:$0xff]   ;;  %v235_v17 = vpack.c.bf16 %v233_v14, %v231_v13  ;;  %v2032_v18 = vld [vmem:[#allocation11 + $0x4] ss:$8 sps:$4 sm:$0xff]   ;;  %v2034_v19 = vld [vmem:[#allocation11] ss:$8 sps:$4 sm:$0xff]  }
 0x105   :  { %444 = vmatprep.subr.bf16.mxu0 %v1990_v4  ;;  %v2035_v20 = vld [vmem:[#allocation11 + $0x14] ss:$8 sps:$4 sm:$0xff]   ;;  %693 = vmatprep.subr.bf16.mxu1 %v2032_v18  ;;  %v2037_v21 = vld [vmem:[#allocation11 + $0x10] ss:$8 sps:$4 sm:$0xff]   ;;  %v2038_v23 = vld [vmem:[#allocation11 + $0x24] ss:$8 sps:$4 sm:$0xff]  }
 0x106   :  { %472 = vmatprep.mubr.bf16.mxu0 %v235_v17  ;;  %694 = vmatpush1.bf16.msra.mxu1 %v2034_v19  ;;  %v2007_v22 = vld [vmem:[#allocation8 + $0x70] ss:$8 sps:$4 sm:$0xff]   ;;  %v2008_v24 = vld [vmem:[#allocation8 + $0x84] ss:$8 sps:$4 sm:$0xff]   ;;  %v2010_v26 = vld [vmem:[#allocation8 + $0x80] ss:$8 sps:$4 sm:$0xff]   ;;  %v270_v17 = vlaneseq }
 0x107   :  { %695 = vmatprep.subr.bf16.mxu1 %v2035_v20  ;;  %v2040_v25 = vld [vmem:[#allocation11 + $0x20] ss:$8 sps:$4 sm:$0xff]   ;;  %v2041_v27 = vld [vmem:[#allocation11 + $0x34] ss:$8 sps:$4 sm:$0xff]   ;;  %v2043_v29 = vld [vmem:[#allocation11 + $0x30] ss:$8 sps:$4 sm:$0xff]  }
 0x108   :  { %445 = vmatpush1.bf16.msra.mxu0 %v1992_v5  ;;  %v2011_v28 = vld [vmem:[#allocation8 + $0x94] ss:$8 sps:$4 sm:$0xff]   ;;  %v2013_v30 = vld [vmem:[#allocation8 + $0x90] ss:$8 sps:$4 sm:$0xff]   ;;  %v2014_v32 = vld [vmem:[#allocation8 + $0xa4] ss:$8 sps:$4 sm:$0xff]  }
 0x109   :  { %446 = vmatprep.subr.bf16.mxu0 %v1993_v6  ;;  %v2044_v31 = vld [vmem:[#allocation11 + $0x44] ss:$8 sps:$4 sm:$0xff]   ;;  %v2046_v34 = vld [vmem:[#allocation11 + $0x40] ss:$8 sps:$4 sm:$0xff]   ;;  %v2017_v35 = vld [vmem:[#allocation8 + $0xb4] ss:$8 sps:$4 sm:$0xff]  }
 0x10a   :  { %696 = vmatpush1.bf16.msra.mxu1 %v2037_v21  ;;  %v2016_v33 = vld [vmem:[#allocation8 + $0xa0] ss:$8 sps:$4 sm:$0xff]   ;;  %v2049_v37 = vld [vmem:[#allocation11 + $0x50] ss:$8 sps:$4 sm:$0xff]   ;;  %v2020_v40 = vld [vmem:[#allocation8 + $0xc4] ss:$8 sps:$4 sm:$0xff]  }
 0x10b   :  { %697 = vmatprep.subr.bf16.mxu1 %v2038_v23  ;;  %v2047_v36 = vld [vmem:[#allocation11 + $0x54] ss:$8 sps:$4 sm:$0xff]   ;;  %v2050_v39 = vld [vmem:[#allocation11 + $0x64] ss:$8 sps:$4 sm:$0xff]   ;;  %v2052_v41 = vld [vmem:[#allocation11 + $0x60] ss:$8 sps:$4 sm:$0xff]  }
 0x10c   :  { %447 = vmatpush1.bf16.msra.mxu0 %v1995_v7  ;;  %v2019_v38 = vld [vmem:[#allocation8 + $0xb0] ss:$8 sps:$4 sm:$0xff]   ;;  %v2022_v42 = vld [vmem:[#allocation8 + $0xc0] ss:$8 sps:$4 sm:$0xff]   ;;  %v2023_v44 = vld [vmem:[#allocation8 + $0xd4] ss:$8 sps:$4 sm:$0xff]  }
 0x10d   :  { %448 = vmatprep.subr.bf16.mxu0 %v1996_v8  ;;  %v2053_v43 = vld [vmem:[#allocation11 + $0x74] ss:$8 sps:$4 sm:$0xff]   ;;  %v2055_v45 = vld [vmem:[#allocation11 + $0x70] ss:$8 sps:$4 sm:$0xff]   ;;  %v2056_v47 = vld [vmem:[#allocation11 + $0x84] ss:$8 sps:$4 sm:$0xff]  }
 0x10e   :  { %698 = vmatpush1.bf16.msra.mxu1 %v2040_v25  ;;  %v2025_v46 = vld [vmem:[#allocation8 + $0xd0] ss:$8 sps:$4 sm:$0xff]   ;;  %v2026_v48 = vld [vmem:[#allocation8 + $0xe4] ss:$8 sps:$4 sm:$0xff]   ;;  %v2028_v50 = vld [vmem:[#allocation8 + $0xe0] ss:$8 sps:$4 sm:$0xff]  }
 0x10f   :  { %699 = vmatprep.subr.bf16.mxu1 %v2041_v27  ;;  %v2058_v49 = vld [vmem:[#allocation11 + $0x80] ss:$8 sps:$4 sm:$0xff]   ;;  %v2059_v51 = vld [vmem:[#allocation11 + $0x94] ss:$8 sps:$4 sm:$0xff]   ;;  %v2061_v53 = vld [vmem:[#allocation11 + $0x90] ss:$8 sps:$4 sm:$0xff]  }
 0x110   :  { %449 = vmatpush1.bf16.msra.mxu0 %v1998_v9  ;;  %v2029_v52 = vld [vmem:[#allocation8 + $0xf4] ss:$8 sps:$4 sm:$0xff]   ;;  %v2031_v54 = vld [vmem:[#allocation8 + $0xf0] ss:$8 sps:$4 sm:$0xff]   ;;  %v232_v56 = vld [vmem:[#allocation2 + $0x10] sm:$0xff]  ;;  %v2890_v18 = vshrl.u32 %v270_v17, 7 }
 0x111   :  { %450 = vmatprep.subr.bf16.mxu0 %v1999_v10  ;;  %v2062_v57 = vld [vmem:[#allocation11 + $0xa4] ss:$8 sps:$4 sm:$0xff]   ;;  %v2064_v58 = vld [vmem:[#allocation11 + $0xa0] ss:$8 sps:$4 sm:$0xff]   ;;  %v2065_v59 = vld [vmem:[#allocation11 + $0xb4] ss:$8 sps:$4 sm:$0xff]   ;;  %v234_v60 = vpack.c.bf16 %v232_v56, %v2887_v55 }
 0x112   :  { %700 = vmatpush1.bf16.msra.mxu1 %v2043_v29  ;;  %v2067_v61 = vld [vmem:[#allocation11 + $0xb0] ss:$8 sps:$4 sm:$0xff]   ;;  %v2068_v62 = vld [vmem:[#allocation11 + $0xc4] ss:$8 sps:$4 sm:$0xff]   ;;  %v2070_v63 = vld [vmem:[#allocation11 + $0xc0] ss:$8 sps:$4 sm:$0xff]  }
 0x113   :  { %701 = vmatprep.subr.bf16.mxu1 %v2044_v31  ;;  %v2071_v0 = vld [vmem:[#allocation11 + $0xd4] ss:$8 sps:$4 sm:$0xff]   ;;  %v2073_v1 = vld [vmem:[#allocation11 + $0xd0] ss:$8 sps:$4 sm:$0xff]   ;;  %v2074_v2 = vld [vmem:[#allocation11 + $0xe4] ss:$8 sps:$4 sm:$0xff]  }
 0x114   :  { %451 = vmatpush1.bf16.msra.mxu0 %v2001_v11  ;;  %v2076_v3 = vld [vmem:[#allocation11 + $0xe0] ss:$8 sps:$4 sm:$0xff]   ;;  %v2077_v4 = vld [vmem:[#allocation11 + $0xf4] ss:$8 sps:$4 sm:$0xff]   ;;  %v2079_v5 = vld [vmem:[#allocation11 + $0xf0] ss:$8 sps:$4 sm:$0xff]  }
 0x115   :  { %452 = vmatprep.subr.bf16.mxu0 %v2002_v12  ;;  %v2080_v6 = vld [vmem:[#allocation14 + $0x40] sm:$0xff]   ;;  %v2082_v8 = vld [vmem:[#allocation14 + $0x48] sm:$0xff]   ;;  %v2084_v10 = vld [vmem:[#allocation14 + $0x50] sm:$0xff]   ;;  %v2893_v19 = vsub.s32 0, %v2890_v18  ;;  %v2896_v21 = vsub.s32 1, %v2890_v18  ;;  %vm1725_vm9 = vcmp.lt.s32.totalorder %v2890_v18, 2 }
 0x116   :  { %702 = vmatpush1.bf16.msra.mxu1 %v2046_v34  ;;  %v2081_v7 = vld [vmem:[#allocation14] sm:$0xff]   ;;  %v2083_v9 = vld [vmem:[#allocation14 + $0x8] sm:$0xff]   ;;  %v2085_v11 = vld [vmem:[#allocation14 + $0x10] sm:$0xff]   ;;  %vm1729_vm10 = vcmask 7168   ;;  %s2612_s8 = smov [#allocation26]  }
 0x117   :  { %703 = vmatprep.subr.bf16.mxu1 %v2047_v36  ;;  %v2086_v12 = vld [vmem:[#allocation14 + $0x58] sm:$0xff]   ;;  %v2088_v14 = vld [vmem:[#allocation14 + $0x60] sm:$0xff]   ;;  %s1749_s27 = sshll.u32 %s2612_s8, 4  ;;  %s1750_s27 = int_to_ptr.vmem [resolvable:$true] %s1749_s27 }
 0x118   :  { %453 = vmatpush1.bf16.msra.mxu0 %v2004_v15  ;;  %v2087_v13 = vld [vmem:[#allocation14 + $0x18] sm:$0xff]   ;;  %v2089_v15 = vld [vmem:[#allocation14 + $0x20] sm:$0xff]   ;;  %s2537_s15 = scalar_lea.vmem %s1750_s27, 256  ;;  %p2542_p1 = scmp.lt.s32.totalorder %s1750_s27, %s1750_s27 }
 0x119   :  { %454 = vmatprep.subr.bf16.mxu0 %v2005_v16  ;;  %v2090_v16 = vld [vmem:[#allocation14 + $0x68] sm:$0xff]   ;;  %v268_v20 = vld [vmem:[#allocation9] sm:$0x3]  ;;  %p2538_p0 = scmp.ne.s32.totalorder %s1750_s27, %s2537_s15  ;;  %p2543_p2 = scmp.lt.s32.totalorder %s2537_s15, %s2537_s15 }
 0x11a   :  { %704 = vmatpush1.bf16.msra.mxu1 %v2049_v37  ;;  %v277_v23 = vrot.slane %v268_v20, %v2896_v21 }
 0x11b   :  { %705 = vmatprep.subr.bf16.mxu1 %v2050_v39  ;;  %v2092_v39 = vld [vmem:[#allocation14 + $0x70] sm:$0xff]   ;;  %p2544_p3 = por %p2543_p2, %p2542_p1 }
 0x11c   :  { %455 = vmatpush1.bf16.msra.mxu0 %v2007_v22  ;;  %v273_v22 = vrot.slane %v268_v20, %v2893_v19 }
 0x11d   :  { %456 = vmatprep.subr.bf16.mxu0 %v2008_v24  ;;  %p2545_p4 = pnand %p2544_p3, %p2538_p0 }
 0x11e   :  { %706 = vmatpush1.bf16.msra.mxu1 %v2052_v41  ;;  %v2094_v41 = vld [vmem:[#allocation14 + $0x78] sm:$0xff]  }
 0x11f   :  { %707 = vmatprep.subr.bf16.mxu1 %v2053_v43  ;;  %v964_v43 = vld [vmem:[#allocation6] sm:$0xff] }
 0x120   :  { %457 = vmatpush1.bf16.msra.mxu0 %v2010_v26  ;;  %968 = vrot.lane.b32.xlu0 %v964_v43, %s2609_s13 }
 0x121   :  { %458 = vmatprep.subr.bf16.mxu0 %v2011_v28 }
 0x122   :  { %708 = vmatpush1.bf16.msra.mxu1 %v2055_v45  ;;  %v521_v45 = vld [vmem:[#allocation12] sm:$0x3] }
 0x123   :  { %709 = vmatprep.subr.bf16.mxu1 %v2056_v47  ;;  %v530_v47 = vrot.slane %v521_v45, %v2896_v21 }
 0x124   :  { %459 = vmatpush1.bf16.msra.mxu0 %v2013_v30 }
 0x125   :  { %460 = vmatprep.subr.bf16.mxu0 %v2014_v32 }
 0x126   :  { %710 = vmatpush1.bf16.msra.mxu1 %v2058_v49 }
 0x127   :  { %711 = vmatprep.subr.bf16.mxu1 %v2059_v51 }
 0x128   :  { %461 = vmatpush1.bf16.msra.mxu0 %v2016_v33 }
 0x129   :  { %462 = vmatprep.subr.bf16.mxu0 %v2017_v35 }
 0x12a   :  { %712 = vmatpush1.bf16.msra.mxu1 %v2061_v53 }
 0x12b   :  { %713 = vmatprep.subr.bf16.mxu1 %v2062_v57 }
 0x12c   :  { %463 = vmatpush1.bf16.msra.mxu0 %v2019_v38  ;;  %v2091_v38 = vld [vmem:[#allocation14 + $0x28] sm:$0xff]  }
 0x12d   :  { %464 = vmatprep.subr.bf16.mxu0 %v2020_v40  ;;  %v2093_v40 = vld [vmem:[#allocation14 + $0x30] sm:$0xff]  }
 0x12e   :  { %714 = vmatpush1.bf16.msra.mxu1 %v2064_v58 }
 0x12f   :  { %715 = vmatprep.subr.bf16.mxu1 %v2065_v59 }
 0x130   :  { %465 = vmatpush1.bf16.msra.mxu0 %v2022_v42  ;;  %v2095_v42 = vld [vmem:[#allocation14 + $0x38] sm:$0xff]  }
 0x131   :  { %466 = vmatprep.subr.bf16.mxu0 %v2023_v44  ;;  %v965_v44 = vld [vmem:[#allocation6 + $0x8] sm:$0xff] }
 0x132   :  { %716 = vmatpush1.bf16.msra.mxu1 %v2067_v61  ;;  %970 = vrot.lane.b32.xlu0 %v965_v44, %s2609_s13  ;;  %v2099_v44 = vld [vmem:[#allocation17 + $0x10] ss:$8 sps:$4 sm:$0xff]  }
 0x133   :  { %717 = vmatprep.subr.bf16.mxu1 %v2068_v62 }
 0x134   :  { %467 = vmatpush1.bf16.msra.mxu0 %v2025_v46  ;;  %v526_v46 = vrot.slane %v521_v45, %v2893_v19  ;;  %v2101_v45 = vld [vmem:[#allocation17 + $0x14] ss:$8 sps:$4 sm:$0xff]  }
 0x135   :  { %468 = vmatprep.subr.bf16.mxu0 %v2026_v48 }
 0x136   :  { %718 = vmatpush1.bf16.msra.mxu1 %v2070_v63  ;;  %v2096_v63 = vld [vmem:[#allocation17] ss:$8 sps:$4 sm:$0xff]  }
 0x137   :  { %719 = vmatprep.subr.bf16.mxu1 %v2071_v0  ;;  %v2098_v0 = vld [vmem:[#allocation17 + $0x4] ss:$8 sps:$4 sm:$0xff]  }
 0x138   :  { %469 = vmatpush1.bf16.msra.mxu0 %v2028_v50 }
 0x139   :  { %470 = vmatprep.subr.bf16.mxu0 %v2029_v52 }
 0x13a   :  { %720 = vmatpush1.bf16.msra.mxu1 %v2073_v1 }
 0x13b   :  { %721 = vmatprep.subr.bf16.mxu1 %v2074_v2  ;;  %v1845_v2 = vld [vmem:[#allocation15] ss:$0 sm:$0xff] }
 0x13c   :  { %471 = vmatpush1.bf16.msra.mxu0 %v2031_v54 }
 0x13d   :  { %1935 = vmatprep.subr.bf16.mxu0 %v2080_v6 }
 0x13e   :  { %722 = vmatpush1.bf16.msra.mxu1 %v2076_v3 }
 0x13f   :  { %473 = vmatmul.mubr.bf16.vlgmr.msra.gmra.mrb[0].mxu0 %v234_v60  ;;  %723 = vmatprep.subr.bf16.mxu1 %v2077_v4 }
 0x140   :  { %1936 = vmatpush3.bf16.msra.mxu0 %v2081_v7 }
 0x141   :  { %1937 = vmatprep.subr.bf16.mxu0 %v2082_v8 }
 0x142   :  { %724 = vmatpush1.bf16.msra.mxu1 %v2079_v5 }
 0x143   :  { %1027 = vmatprep.subr.bf16.mxu1 %v2098_v0 }
 0x144   :  { %1938 = vmatpush3.bf16.msra.mxu0 %v2083_v9 }
 0x145   :  { %1939 = vmatprep.subr.bf16.mxu0 %v2084_v10 }
 0x148   :  { %1940 = vmatpush3.bf16.msra.mxu0 %v2085_v11 }
 0x149   :  { %1941 = vmatprep.subr.bf16.mxu0 %v2086_v12 }
 0x14c   :  { %1942 = vmatpush3.bf16.msra.mxu0 %v2087_v13 }
 0x14d   :  { %1943 = vmatprep.subr.bf16.mxu0 %v2088_v14 }
 0x150   :  { %1944 = vmatpush3.bf16.msra.mxu0 %v2089_v15 }
 0x151   :  { %1945 = vmatprep.subr.bf16.mxu0 %v2090_v16 }
 0x154   :  { %1946 = vmatpush3.bf16.msra.mxu0 %v2091_v38 }
 0x155   :  { %1947 = vmatprep.subr.bf16.mxu0 %v2092_v39 }
 0x158   :  { %1948 = vmatpush3.bf16.msra.mxu0 %v2093_v40 }
 0x159   :  { %1949 = vmatprep.subr.bf16.mxu0 %v2094_v41 }
 0x15c   :  { %1950 = vmatpush3.bf16.msra.mxu0 %v2095_v42 }
 0x212   :  { %v474_v24 = vpop.f32.mrb[0].mxu0 }
 0x213   :  { %v475_v25 = vadd.f32 %v474_v24, %v273_v22  ;;  %v476_v26 = vpop.f32.mrb[1].mxu0 }
 0x214   :  { %v477_v27 = vadd.f32 %v476_v26, %v277_v23  ;;  %v478_v28 = vpop.f32.mrb[2].mxu0 }
 0x215   :  { %v479_v29 = vadd.f32 %v478_v28, %v273_v22  ;;  %v480_v30 = vpop.f32.mrb[3].mxu0  ;;  %v483_v32 = vmax.f32 %v475_v25, 0.0 }
 0x216   :  { %v481_v31 = vadd.f32 %v480_v30, %v277_v23  ;;  %v484_v34 = vmax.f32 %v477_v27, 0.0 }
 0x217   :  { %v485_v33 = vmax.f32 %v479_v29, 0.0 }
 0x218   :  { %v486_v35 = vmax.f32 %v481_v31, 0.0 }
 0x219   :  { %v487_v36 = vpack.c.bf16 %v485_v33, %v483_v32 }
 0x21a   :  { %v488_v37 = vpack.c.bf16 %v486_v35, %v484_v34 }
 0x21c   :  { %725 = vmatprep.mubr.bf16.mxu1 %v488_v37 }
 0x21d   :  { %726 = vmatmul.mubr.bf16.vlgmr.msra.gmra.mrb[0].mxu1 %v487_v36 }
 0x21e   :  { %1028 = vmatpush1.bf16.msra.mxu1 %v2096_v63  ;;  %v2104_v63 = vld [vmem:[#allocation20 + $0x4] ss:$8 sps:$4 sm:$0xff]  }
 0x21f   :  { %1029 = vmatprep.subr.bf16.mxu1 %v2101_v45  ;;  %v2147_v45 = vld [vmem:[#allocation20 + $0xf0] ss:$8 sps:$4 sm:$0xff]  }
 0x222   :  { %1030 = vmatpush1.bf16.msra.mxu1 %v2099_v44  ;;  %v2149_v44 = vld [vmem:[#allocation20 + $0xf4] ss:$8 sps:$4 sm:$0xff]  }
 0x223   :  { %1280 = vmatprep.subr.bf16.mxu1 %v2104_v63  ;;  %v2176_v63 = vld [vmem:[#allocation23 + $0x84] ss:$8 sps:$4 sm:$0xff]  }
 0x2f0   :  { %v727_v48 = vpop.f32.mrb[0].mxu1 }
 0x2f1   :  { %v728_v49 = vadd.f32 %v727_v48, %v526_v46  ;;  %v729_v50 = vpop.f32.mrb[1].mxu1 }
 0x2f2   :  { %v730_v51 = vadd.f32 %v729_v50, %v530_v47  ;;  %v731_v52 = vpop.f32.mrb[2].mxu1 }
 0x2f3   :  { %v732_v53 = vadd.f32 %v731_v52, %v526_v46  ;;  %v733_v54 = vpop.f32.mrb[3].mxu1  ;;  %v736_v57 = vmax.f32 %v728_v49, 0.0  ;;  %v2610_v49 = vmov 0  }
 0x2f4   :  { %v734_v56 = vadd.f32 %v733_v54, %v530_v47  ;;  %v737_v59 = vmax.f32 %v730_v51, 0.0  ;;  %v969_v47 = vpop.permute.xlu0 %968  ;;  %1059 = vmatprep.mubr.bf16.mxu1 %v2610_v49  ;;  %v2153_v49 = vld [vmem:[#allocation23 + $0x10] ss:$8 sps:$4 sm:$0xff]  }
 0x2f5   :  { %v738_v58 = vmax.f32 %v732_v53, 0.0 }
 0x2f6   :  { %v739_v60 = vmax.f32 %v734_v56, 0.0 }
 0x2f7   :  { %v740_v61 = vpack.c.bf16 %v738_v58, %v736_v57 }
 0x2f8   :  { %v741_v62 = vpack.c.bf16 %v739_v60, %v737_v59  ;;  %v971_v59 = vpop.permute.xlu0 %970 }
 0x2fa   :  { %909 = vmatprep.mubr.bf16.mxu0 %v741_v62 }
 0x2fb   :  { %910 = vmatmul.mubr.bf16.vlgmr.msra.gmra.mrb[4].mxu0 %v740_v61 }
 0x3ce   :  { %v1951_v1 = vpop.f32.mrb[4].mxu0 }
 0x3cf   :  { %v1952_v3 = vpop.f32.mrb[5].mxu0 }
 0x3d0   :  { %v1953_v4 = vadd.f32 %v1952_v3, %v1951_v1  ;;  %v1954_v5 = vpop.f32.mrb[6].mxu0 }
 0x3d1   :  { %v1955_v6 = vpop.f32.mrb[7].mxu0 }
 0x3d2   :  { %v2904_v7 = vadd.f32 %v1953_v4, %v1845_v2  ;;  %v1956_v8 = vadd.f32 %v1955_v6, %v1954_v5 }
 0x3d4   :  { %v920_v9 = vand.u32 2147483647, %v2904_v7  ;;  %v2907_v10 = vadd.f32 %v1956_v8, %v1845_v2  ;;  %v1612_v11 = vmul.f32 %v2904_v7, %v2904_v7  ;;  %v918_v34 = vmax.f32 %v2904_v7, 0.0 }
 0x3d6   :  { %v922_v12 = vsub.f32 0.0, %v920_v9  ;;  %v921_v13 = vand.u32 2147483647, %v2907_v10  ;;  %1616 = vrot.lane.b32.xlu0 %v1612_v11, %s2609_s13  ;;  %v919_v39 = vmax.f32 %v2907_v10, 0.0  ;;  %v2102_v11 = vld [vmem:[#allocation20] ss:$8 sps:$4 sm:$0xff]  }
 0x3d8   :  { %v924_v14 = vmul.f32 1.442695, %v922_v12  ;;  %v923_v15 = vsub.f32 0.0, %v921_v13  ;;  %v2107_v13 = vld [vmem:[#allocation20 + $0x14] ss:$8 sps:$4 sm:$0xff]  }
 0x3da   :  { %2198 = vpow2.f32 %v924_v14  ;;  %v926_v16 = vmul.f32 1.442695, %v923_v15  ;;  %v2105_v14 = vld [vmem:[#allocation20 + $0x10] ss:$8 sps:$4 sm:$0xff]   ;;  %v2110_v15 = vld [vmem:[#allocation20 + $0x24] ss:$8 sps:$4 sm:$0xff]  }
 0x3dc   :  { %2200 = vpow2.f32 %v926_v16  ;;  %v2108_v16 = vld [vmem:[#allocation20 + $0x20] ss:$8 sps:$4 sm:$0xff]  }
 0x3e4   :  { %v2199_v17 = vpop.eup %2198 }
 0x3e5   :  { %v928_v20 = vadd.f32 1.0, %v2199_v17  ;;  %v931_v24 = vmul.f32 -0.5, %v2199_v17  ;;  %v934_v27 = vand.u32 2147483647, %v2199_v17 }
 0x3e6   :  { %v2201_v22 = vpop.eup %2200 }
 0x3e7   :  { %2202 = vlog2.f32 %v928_v20  ;;  %v937_v23 = vadd.f32 1.0, %v2201_v22  ;;  %v940_v25 = vmul.f32 -0.5, %v2201_v22  ;;  %v932_v26 = vadd.f32 1.0, %v931_v24  ;;  %v2111_v20 = vld [vmem:[#allocation20 + $0x30] ss:$8 sps:$4 sm:$0xff]  }
 0x3e8   :  { %v943_v30 = vand.u32 2147483647, %v2201_v22  ;;  %vm935_vm0 = vcmp.lt.f32.partialorder %v934_v27, 0.0004427343  ;;  %v2122_v24 = vld [vmem:[#allocation20 + $0x64] ss:$8 sps:$4 sm:$0xff]  }
 0x3e9   :  { %2204 = vlog2.f32 %v937_v23  ;;  %v941_v28 = vadd.f32 1.0, %v940_v25  ;;  %v933_v32 = vmul.f32 %v2199_v17, %v932_v26  ;;  %v2113_v17 = vld [vmem:[#allocation20 + $0x34] ss:$8 sps:$4 sm:$0xff]   ;;  %v2117_v23 = vld [vmem:[#allocation20 + $0x50] ss:$8 sps:$4 sm:$0xff]  }
 0x3ea   :  { %vm944_vm1 = vcmp.lt.f32.partialorder %v943_v30, 0.0004427343  ;;  %v2120_v25 = vld [vmem:[#allocation20 + $0x60] ss:$8 sps:$4 sm:$0xff]   ;;  %v2125_v26 = vld [vmem:[#allocation20 + $0x74] ss:$8 sps:$4 sm:$0xff]  }
 0x3eb   :  { %v942_v37 = vmul.f32 %v2201_v22, %v941_v28  ;;  %v2119_v22 = vld [vmem:[#allocation20 + $0x54] ss:$8 sps:$4 sm:$0xff]   ;;  %v2123_v27 = vld [vmem:[#allocation20 + $0x70] ss:$8 sps:$4 sm:$0xff]   ;;  %v2128_v28 = vld [vmem:[#allocation20 + $0x84] ss:$8 sps:$4 sm:$0xff]  }
 0x3ec   :  { %v2131_v30 = vld [vmem:[#allocation20 + $0x94] ss:$8 sps:$4 sm:$0xff]  }
 0x3f1   :  { %v2203_v29 = vpop.eup %2202 }
 0x3f2   :  { %v930_v31 = vmul.f32 0.6931472, %v2203_v29  ;;  %v2126_v29 = vld [vmem:[#allocation20 + $0x80] ss:$8 sps:$4 sm:$0xff]  }
 0x3f3   :  { %v2205_v33 = vpop.eup %2204 }
 0x3f4   :  { %v936_v35 = vsel %vm935_vm0, %v933_v32, %v930_v31  ;;  %v939_v36 = vmul.f32 0.6931472, %v2205_v33  ;;  %v2129_v31 = vld [vmem:[#allocation20 + $0x90] ss:$8 sps:$4 sm:$0xff]   ;;  %v2134_v32 = vld [vmem:[#allocation20 + $0xa4] ss:$8 sps:$4 sm:$0xff]  }
 0x3f5   :  { %v946_v38 = vadd.f32 %v936_v35, %v918_v34  ;;  %v2132_v33 = vld [vmem:[#allocation20 + $0xa0] ss:$8 sps:$4 sm:$0xff]  }
 0x3f6   :  { %v945_v40 = vsel %vm944_vm1, %v942_v37, %v939_v36  ;;  %v2137_v36 = vld [vmem:[#allocation20 + $0xb4] ss:$8 sps:$4 sm:$0xff]   ;;  %v2135_v37 = vld [vmem:[#allocation20 + $0xb0] ss:$8 sps:$4 sm:$0xff]  }
 0x3f7   :  { %v948_v41 = vadd.f32 1e-08, %v946_v38  ;;  %v947_v42 = vadd.f32 %v945_v40, %v919_v39  ;;  %v2138_v39 = vld [vmem:[#allocation20 + $0xc0] ss:$8 sps:$4 sm:$0xff]   ;;  %v2143_v40 = vld [vmem:[#allocation20 + $0xd4] ss:$8 sps:$4 sm:$0xff]  }
 0x3f9   :  { %v949_v43 = vadd.f32 1e-08, %v947_v42  ;;  %2206 = vrsqrt.f32 %v948_v41  ;;  %vm952_vm2 = vcmp.eq.f32.partialorder %v948_v41, inf  ;;  %v955_v51 = vand.u32 2147483648, %v948_v41  ;;  %v2146_v42 = vld [vmem:[#allocation20 + $0xe4] ss:$8 sps:$4 sm:$0xff]  }
 0x3fa   :  { %vm954_vm3 = vcmp.eq.f32.partialorder %v948_v41, 0.0 }
 0x3fb   :  { %2208 = vrsqrt.f32 %v949_v43  ;;  %vm959_vm4 = vcmp.eq.f32.partialorder %v949_v43, inf  ;;  %v962_v56 = vand.u32 2147483648, %v949_v43  ;;  %vm961_vm5 = vcmp.eq.f32.partialorder %v949_v43, 0.0 }
 0x3fc   :  { %2210 = vlog2.f32 %v948_v41 }
 0x403   :  { %v2207_v46 = vpop.eup %2206 }
 0x404   :  { %v951_v48 = vmul.f32 %v2207_v46, %v948_v41  ;;  %v2150_v46 = vld [vmem:[#allocation23] ss:$8 sps:$4 sm:$0xff]  }
 0x405   :  { %v2209_v50 = vpop.eup %2208 }
 0x406   :  { %v953_v52 = vsel %vm952_vm2, %v948_v41, %v951_v48  ;;  %v958_v53 = vmul.f32 %v2209_v50, %v949_v43  ;;  %v2211_v62 = vpop.eup %2210  ;;  %v2141_v41 = vld [vmem:[#allocation20 + $0xd0] ss:$8 sps:$4 sm:$0xff]  }
 0x407   :  { %v956_v54 = vsel %vm954_vm3, %v955_v51, %v953_v52  ;;  %v1607_v0 = vmul.f32 0.6931472, %v2211_v62  ;;  %v2155_v48 = vld [vmem:[#allocation23 + $0x14] ss:$8 sps:$4 sm:$0xff]   ;;  %v2158_v50 = vld [vmem:[#allocation23 + $0x24] ss:$8 sps:$4 sm:$0xff]  }
 0x408   :  { %v974_v57 = vmul.f32 %v969_v47, %v956_v54  ;;  %v960_v58 = vsel %vm959_vm4, %v949_v43, %v958_v53  ;;  %v2144_v43 = vld [vmem:[#allocation20 + $0xe0] ss:$8 sps:$4 sm:$0xff]   ;;  %v2159_v53 = vld [vmem:[#allocation23 + $0x30] ss:$8 sps:$4 sm:$0xff]  }
 0x409   :  { %v963_v60 = vsel %vm961_vm5, %v962_v56, %v960_v58  ;;  %v1610_v1 = vadd.f32 1.0, %v1607_v0  ;;  %v2152_v47 = vld [vmem:[#allocation23 + $0x4] ss:$8 sps:$4 sm:$0xff]   ;;  %v2156_v51 = vld [vmem:[#allocation23 + $0x20] ss:$8 sps:$4 sm:$0xff]  }
 0x40a   :  { %978 = vrot.lane.b32.xlu1 %v974_v57, %s2611_s1  ;;  %v975_v61 = vmul.f32 %v971_v59, %v963_v60  ;;  %1533 = vmatprep.subr.bf16.mxu0 %v2152_v47  ;;  %v2161_v52 = vld [vmem:[#allocation23 + $0x34] ss:$8 sps:$4 sm:$0xff]   ;;  %v2164_v54 = vld [vmem:[#allocation23 + $0x44] ss:$8 sps:$4 sm:$0xff]   ;;  %v2162_v56 = vld [vmem:[#allocation23 + $0x40] ss:$8 sps:$4 sm:$0xff]  }
 0x40b   :  { %1534 = vmatpush1.bf16.msra.mxu0 %v2150_v46  ;;  %v2167_v57 = vld [vmem:[#allocation23 + $0x54] ss:$8 sps:$4 sm:$0xff]   ;;  %v2165_v58 = vld [vmem:[#allocation23 + $0x50] ss:$8 sps:$4 sm:$0xff]   ;;  %v2170_v59 = vld [vmem:[#allocation23 + $0x64] ss:$8 sps:$4 sm:$0xff]  }
 0x40c   :  { %1535 = vmatprep.subr.bf16.mxu0 %v2155_v48  ;;  %v2168_v60 = vld [vmem:[#allocation23 + $0x60] ss:$8 sps:$4 sm:$0xff]   ;;  %v2171_v62 = vld [vmem:[#allocation23 + $0x70] ss:$8 sps:$4 sm:$0xff]  }
 0x40d   :  { %v2174_v0 = vld [vmem:[#allocation23 + $0x80] ss:$8 sps:$4 sm:$0xff]  }
 0x40e   :  { %980 = vrot.lane.b32.xlu1 %v975_v61, %s2611_s1  ;;  %v2173_v61 = vld [vmem:[#allocation23 + $0x74] ss:$8 sps:$4 sm:$0xff]  }
 0x40f   :  { %1536 = vmatpush1.bf16.msra.mxu0 %v2153_v49 }
 0x410   :  { %1537 = vmatprep.subr.bf16.mxu0 %v2158_v50 }
 0x413   :  { %1538 = vmatpush1.bf16.msra.mxu0 %v2156_v51 }
 0x414   :  { %1539 = vmatprep.subr.bf16.mxu0 %v2161_v52  ;;  %v1361_v52 = vld [vmem:[#allocation24] sm:$0x3] }
 0x417   :  { %1540 = vmatpush1.bf16.msra.mxu0 %v2159_v53  ;;  %v1366_v53 = vrot.slane %v1361_v52, %v2893_v19 }
 0x418   :  { %1541 = vmatprep.subr.bf16.mxu0 %v2164_v54  ;;  %v1370_v54 = vrot.slane %v1361_v52, %v2896_v21 }
 0x41b   :  { %1542 = vmatpush1.bf16.msra.mxu0 %v2162_v56 }
 0x41c   :  { %1543 = vmatprep.subr.bf16.mxu0 %v2167_v57 }
 0x41f   :  { %1544 = vmatpush1.bf16.msra.mxu0 %v2165_v58 }
 0x420   :  { %1545 = vmatprep.subr.bf16.mxu0 %v2170_v59 }
 0x423   :  { %1546 = vmatpush1.bf16.msra.mxu0 %v2168_v60 }
 0x424   :  { %1547 = vmatprep.subr.bf16.mxu0 %v2173_v61 }
 0x427   :  { %1548 = vmatpush1.bf16.msra.mxu0 %v2171_v62 }
 0x428   :  { %1549 = vmatprep.subr.bf16.mxu0 %v2176_v63 }
 0x42b   :  { %1550 = vmatpush1.bf16.msra.mxu0 %v2174_v0 }
 0x448   :  { %v1617_v2 = vpop.permute.xlu0 %1616 }
 0x449   :  { %v1622_v3 = vsub.f32 %v1610_v1, %v1617_v2  ;;  %v2179_v1 = vld [vmem:[#allocation23 + $0x94] ss:$8 sps:$4 sm:$0xff]   ;;  %v2177_v2 = vld [vmem:[#allocation23 + $0x90] ss:$8 sps:$4 sm:$0xff]  }
 0x44a   :  { %1551 = vmatprep.subr.bf16.mxu0 %v2179_v1 }
 0x44b   :  { %v1624_v4 = vsub.f32 %v1622_v3, %v946_v38  ;;  %v2140_v38 = vld [vmem:[#allocation20 + $0xc4] ss:$8 sps:$4 sm:$0xff]   ;;  %1552 = vmatpush1.bf16.msra.mxu0 %v2177_v2 }
 0x44c   :  { %v2182_v3 = vld [vmem:[#allocation23 + $0xa4] ss:$8 sps:$4 sm:$0xff]  }
 0x44d   :  { %1628 = vrot.lane.b32.xlu1 %v1624_v4, %s2611_s1  ;;  %v2180_v4 = vld [vmem:[#allocation23 + $0xa0] ss:$8 sps:$4 sm:$0xff]   ;;  %1553 = vmatprep.subr.bf16.mxu0 %v2182_v3 }
 0x44f   :  { %1554 = vmatpush1.bf16.msra.mxu0 %v2180_v4 }
 0x47c   :  { %v979_v5 = vpop.permute.xlu1 %978 }
 0x47d   :  { %v984_v8 = vadd.f32 %v979_v5, %v2904_v7  ;;  %v2116_v7 = vld [vmem:[#allocation20 + $0x44] ss:$8 sps:$4 sm:$0xff]   ;;  %v2185_v5 = vld [vmem:[#allocation23 + $0xb4] ss:$8 sps:$4 sm:$0xff]  }
 0x47e   :  { %1555 = vmatprep.subr.bf16.mxu0 %v2185_v5 }
 0x480   :  { %v981_v6 = vpop.permute.xlu1 %980 }
 0x481   :  { %v985_v9 = vadd.f32 %v981_v6, %v2907_v10  ;;  %v2114_v10 = vld [vmem:[#allocation20 + $0x40] ss:$8 sps:$4 sm:$0xff]   ;;  %v2183_v6 = vld [vmem:[#allocation23 + $0xb0] ss:$8 sps:$4 sm:$0xff]  }
 0x482   :  { %1556 = vmatpush1.bf16.msra.mxu0 %v2183_v6 }
 0x483   :  { %v986_v12 = vpack.c.bf16 %v985_v9, %v984_v8  ;;  %v2188_v8 = vld [vmem:[#allocation23 + $0xc4] ss:$8 sps:$4 sm:$0xff]   ;;  %v2186_v9 = vld [vmem:[#allocation23 + $0xc0] ss:$8 sps:$4 sm:$0xff]  }
 0x484   :  { %1557 = vmatprep.subr.bf16.mxu0 %v2188_v8 }
 0x485   :  { %1866 = vmatmul.mubr.msk.bf16.vlgmr.msra.gmra.mrb[4].mxu1 %vm1023_vm6, %v986_v12  ;;  %v2189_v12 = vld [vmem:[#allocation23 + $0xd0] ss:$8 sps:$4 sm:$0xff]  }
 0x486   :  { %1281 = vmatpush1.bf16.msra.mxu1 %v2102_v11  ;;  %v2191_v11 = vld [vmem:[#allocation23 + $0xd4] ss:$8 sps:$4 sm:$0xff]   ;;  %1558 = vmatpush1.bf16.msra.mxu0 %v2186_v9 }
 0x487   :  { %1282 = vmatprep.subr.bf16.mxu1 %v2107_v13  ;;  %1559 = vmatprep.subr.bf16.mxu0 %v2191_v11  ;;  %v991_v13 = vld [vmem:[#allocation18] sm:$0x3] }
 0x48a   :  { %1283 = vmatpush1.bf16.msra.mxu1 %v2105_v14  ;;  %1560 = vmatpush1.bf16.msra.mxu0 %v2189_v12  ;;  %v996_v14 = vrot.slane %v991_v13, %v2893_v19 }
 0x48b   :  { %1284 = vmatprep.subr.bf16.mxu1 %v2110_v15  ;;  %v1000_v15 = vrot.slane %v991_v13, %v2896_v21 }
 0x48e   :  { %1285 = vmatpush1.bf16.msra.mxu1 %v2108_v16 }
 0x48f   :  { %1286 = vmatprep.subr.bf16.mxu1 %v2113_v17 }
 0x492   :  { %1287 = vmatpush1.bf16.msra.mxu1 %v2111_v20 }
 0x493   :  { %1288 = vmatprep.subr.bf16.mxu1 %v2116_v7 }
 0x496   :  { %1289 = vmatpush1.bf16.msra.mxu1 %v2114_v10 }
 0x497   :  { %1290 = vmatprep.subr.bf16.mxu1 %v2119_v22 }
 0x49a   :  { %1291 = vmatpush1.bf16.msra.mxu1 %v2117_v23 }
 0x49b   :  { %1292 = vmatprep.subr.bf16.mxu1 %v2122_v24 }
 0x49e   :  { %1293 = vmatpush1.bf16.msra.mxu1 %v2120_v25 }
 0x49f   :  { %1294 = vmatprep.subr.bf16.mxu1 %v2125_v26 }
 0x4a2   :  { %1295 = vmatpush1.bf16.msra.mxu1 %v2123_v27 }
 0x4a3   :  { %1296 = vmatprep.subr.bf16.mxu1 %v2128_v28 }
 0x4a6   :  { %1297 = vmatpush1.bf16.msra.mxu1 %v2126_v29 }
 0x4a7   :  { %1298 = vmatprep.subr.bf16.mxu1 %v2131_v30 }
 0x4aa   :  { %1299 = vmatpush1.bf16.msra.mxu1 %v2129_v31  ;;  %v2194_v31 = vld [vmem:[#allocation23 + $0xe4] ss:$8 sps:$4 sm:$0xff]  }
 0x4ab   :  { %1300 = vmatprep.subr.bf16.mxu1 %v2134_v32  ;;  %v2192_v32 = vld [vmem:[#allocation23 + $0xe0] ss:$8 sps:$4 sm:$0xff]   ;;  %1561 = vmatprep.subr.bf16.mxu0 %v2194_v31 }
 0x4ac   :  { %1562 = vmatpush1.bf16.msra.mxu0 %v2192_v32 }
 0x4ae   :  { %1301 = vmatpush1.bf16.msra.mxu1 %v2132_v33  ;;  %v2197_v33 = vld [vmem:[#allocation23 + $0xf4] ss:$8 sps:$4 sm:$0xff]  }
 0x4af   :  { %1302 = vmatprep.subr.bf16.mxu1 %v2137_v36  ;;  %1563 = vmatprep.subr.bf16.mxu0 %v2197_v33 }
 0x4b2   :  { %1303 = vmatpush1.bf16.msra.mxu1 %v2135_v37 }
 0x4b3   :  { %1304 = vmatprep.subr.bf16.mxu1 %v2140_v38 }
 0x4b6   :  { %1305 = vmatpush1.bf16.msra.mxu1 %v2138_v39 }
 0x4b7   :  { %1306 = vmatprep.subr.bf16.mxu1 %v2143_v40 }
 0x4ba   :  { %1307 = vmatpush1.bf16.msra.mxu1 %v2141_v41 }
 0x4bb   :  { %1308 = vmatprep.subr.bf16.mxu1 %v2146_v42 }
 0x4be   :  { %1309 = vmatpush1.bf16.msra.mxu1 %v2144_v43 }
 0x4bf   :  { %v1629_v34 = vpop.permute.xlu1 %1628  ;;  %1310 = vmatprep.subr.bf16.mxu1 %v2149_v44 }
 0x4c0   :  { %v1634_v35 = vsel %vm1023_vm6, %v1629_v34, 0.0  ;;  %v2195_v34 = vld [vmem:[#allocation23 + $0xf0] ss:$8 sps:$4 sm:$0xff]  }
 0x4c1   :  { %1635 = vadd.xlane.f32.xlu0 %v1634_v35  ;;  %1564 = vmatpush1.bf16.msra.mxu0 %v2195_v34  ;;  %v1108_v35 = vld [vmem:[#allocation21] sm:$0x3] }
 0x4c2   :  { %1311 = vmatpush1.bf16.msra.mxu1 %v2147_v45  ;;  %v1113_v36 = vrot.slane %v1108_v35, %v2893_v19  ;;  %v1117_v37 = vrot.slane %v1108_v35, %v2896_v21 }
 0x558   :  { %v1061_v16 = vpop.f32.mrb[4].mxu1 }
 0x559   :  { %v1062_v17 = vadd.f32 %v1061_v16, %v996_v14  ;;  %v1063_v20 = vpop.f32.mrb[5].mxu1 }
 0x55a   :  { %v1064_v7 = vadd.f32 %v1063_v20, %v1000_v15  ;;  %v1065_v10 = vpop.f32.mrb[6].mxu1 }
 0x55b   :  { %v1066_v22 = vadd.f32 %v1065_v10, %v996_v14  ;;  %v1067_v23 = vpop.f32.mrb[7].mxu1  ;;  %v1070_v25 = vmax.f32 %v1062_v17, 0.0 }
 0x55c   :  { %v1068_v24 = vadd.f32 %v1067_v23, %v1000_v15  ;;  %v1071_v27 = vmax.f32 %v1064_v7, 0.0 }
 0x55d   :  { %v1072_v26 = vmax.f32 %v1066_v22, 0.0 }
 0x55e   :  { %v1073_v28 = vmax.f32 %v1068_v24, 0.0 }
 0x55f   :  { %v1074_v29 = vpack.c.bf16 %v1072_v26, %v1070_v25 }
 0x560   :  { %v1075_v30 = vpack.c.bf16 %v1073_v28, %v1071_v27 }
 0x562   :  { %1312 = vmatprep.mubr.bf16.mxu1 %v1075_v30 }
 0x563   :  { %1313 = vmatmul.mubr.bf16.vlgmr.msra.gmra.mrb[8].mxu1 %v1074_v29 }
 0x636   :  { %v1314_v38 = vpop.f32.mrb[8].mxu1 }
 0x637   :  { %v1315_v39 = vadd.f32 %v1314_v38, %v1113_v36  ;;  %v1316_v40 = vpop.f32.mrb[9].mxu1 }
 0x638   :  { %v1317_v41 = vadd.f32 %v1316_v40, %v1117_v37  ;;  %v1318_v42 = vpop.f32.mrb[10].mxu1 }
 0x639   :  { %v1319_v43 = vadd.f32 %v1318_v42, %v1113_v36  ;;  %v1320_v44 = vpop.f32.mrb[11].mxu1  ;;  %v1323_v46 = vmax.f32 %v1315_v39, 0.0 }
 0x63a   :  { %v1321_v45 = vadd.f32 %v1320_v44, %v1117_v37  ;;  %v1324_v48 = vmax.f32 %v1317_v41, 0.0 }
 0x63b   :  { %v1325_v47 = vmax.f32 %v1319_v43, 0.0 }
 0x63c   :  { %v1326_v49 = vmax.f32 %v1321_v45, 0.0 }
 0x63d   :  { %v1327_v50 = vpack.c.bf16 %v1325_v47, %v1323_v46  ;;  %v2228_v47 = vld [vmem:[#allocation2 + $0x8] sm:$0xff] }
 0x63e   :  { %v1328_v51 = vpack.c.bf16 %v1326_v49, %v1324_v48 }
 0x640   :  { %1565 = vmatprep.mubr.bf16.mxu0 %v1328_v51 }
 0x641   :  { %1566 = vmatmul.mubr.bf16.vlgmr.msra.gmra.mrb[8].mxu0 %v1327_v50 }
 0x714   :  { %v1567_v56 = vpop.f32.mrb[8].mxu0 }
 0x715   :  { %v2925_v57 = vadd.f32 %v1567_v56, %v1366_v53  ;;  %v1569_v58 = vpop.f32.mrb[9].mxu0 }
 0x716   :  { %v2927_v59 = vadd.f32 %v1569_v58, %v1370_v54  ;;  %v1571_v60 = vpop.f32.mrb[10].mxu0 }
 0x717   :  { %v1576_v61 = vmul.f32 0.5, %v2925_v57  ;;  %v1650_v62 = vand.u32 2147483647, %v2925_v57  ;;  %v1572_v63 = vadd.f32 %v1571_v60, %v1366_v53  ;;  %v1573_v0 = vpop.f32.mrb[11].mxu0  ;;  %v1646_v39 = vmax.f32 %v2925_v57, 0.0  ;;  %v1636_v53 = vpop.xlane.xlu0 %1635 }
 0x718   :  { %v1577_v1 = vmul.f32 0.5, %v2927_v59  ;;  %v1651_v2 = vand.u32 2147483647, %v2927_v59  ;;  %v1574_v19 = vadd.f32 %v1573_v0, %v1370_v54  ;;  %v1647_v42 = vmax.f32 %v2927_v59, 0.0 }
 0x719   :  { %2212 = vtanh.f32 %v1576_v61  ;;  %v1654_v21 = vsub.f32 0.0, %v1650_v62  ;;  %v1578_v3 = vmul.f32 0.5, %v1572_v63  ;;  %v1642_v44 = vmul.f32 %v2925_v57, %v2887_v55 }
 0x71a   :  { %2214 = vtanh.f32 %v1577_v1  ;;  %v1655_v4 = vsub.f32 0.0, %v1651_v2  ;;  %v1579_v5 = vmul.f32 0.5, %v1574_v19  ;;  %v1643_v48 = vmul.f32 %v2228_v47, %v2927_v59 }
 0x71b   :  { %v1658_v6 = vmul.f32 1.442695, %v1654_v21  ;;  %2216 = vtanh.f32 %v1578_v3  ;;  %v1640_v54 = vmul.f32 0.5, %v1636_v53 }
 0x71c   :  { %v1660_v8 = vmul.f32 1.442695, %v1655_v4  ;;  %2218 = vtanh.f32 %v1579_v5 }
 0x71d   :  { %2220 = vpow2.f32 %v1658_v6 }
 0x71e   :  { %2222 = vpow2.f32 %v1660_v8 }
 0x723   :  { %v2213_v9 = vpop.eup %2212 }
 0x724   :  { %v2215_v11 = vpop.eup %2214  ;;  %v1584_v12 = vadd.f32 1.0, %v2213_v9 }
 0x725   :  { %v2217_v13 = vpop.eup %2216  ;;  %v1585_v14 = vadd.f32 1.0, %v2215_v11 }
 0x726   :  { %v2219_v15 = vpop.eup %2218  ;;  %v1586_v16 = vadd.f32 1.0, %v2217_v13  ;;  %v1588_v17 = vmul.f32 0.5, %v1584_v12 }
 0x727   :  { %v2221_v20 = vpop.eup %2220  ;;  %v1587_v7 = vadd.f32 1.0, %v2219_v15  ;;  %v1589_v10 = vmul.f32 0.5, %v1585_v14 }
 0x728   :  { %v2223_v22 = vpop.eup %2222  ;;  %v1590_v23 = vmul.f32 0.5, %v1586_v16  ;;  %v1666_v24 = vadd.f32 1.0, %v2221_v20  ;;  %v1669_v29 = vmul.f32 -0.5, %v2221_v20  ;;  %v1672_v32 = vand.u32 2147483647, %v2221_v20 }
 0x729   :  { %v1591_v25 = vmul.f32 0.5, %v1587_v7  ;;  %v1675_v26 = vadd.f32 1.0, %v2223_v22  ;;  %v1933_v27 = vpack.c.bf16 %v1589_v10, %v1588_v17  ;;  %v1678_v30 = vmul.f32 -0.5, %v2223_v22 }
 0x72a   :  { %2224 = vlog2.f32 %v1666_v24  ;;  %v1670_v31 = vadd.f32 1.0, %v1669_v29  ;;  %v1681_v34 = vand.u32 2147483647, %v2223_v22  ;;  %vm1673_vm7 = vcmp.lt.f32.partialorder %v1672_v32, 0.0004427343 }
 0x72b   :  { %2226 = vlog2.f32 %v1675_v26  ;;  %v1934_v28 = vpack.c.bf16 %v1591_v25, %v1590_v23  ;;  %1604 = vst [vmem:[#allocation26] sm:$0xff] %v1933_v27  ;;  %v1679_v33 = vadd.f32 1.0, %v1678_v30 }
 0x72c   :  { %v1671_v38 = vmul.f32 %v2221_v20, %v1670_v31  ;;  %vm1682_vm8 = vcmp.lt.f32.partialorder %v1681_v34, 0.0004427343 }
 0x72d   :  { %1605 = vst [vmem:[#allocation26 + $0x8] sm:$0xff] %v1934_v28  ;;  %v1680_v41 = vmul.f32 %v2223_v22, %v1679_v33 }
 0x734   :  { %v2225_v35 = vpop.eup %2224 }
 0x735   :  { %v2227_v36 = vpop.eup %2226  ;;  %v1668_v37 = vmul.f32 0.6931472, %v2225_v35 }
 0x736   :  { %v1677_v40 = vmul.f32 0.6931472, %v2227_v36 }
 0x737   :  { %v1674_v43 = vsel %vm1673_vm7, %v1671_v38, %v1668_v37 }
 0x738   :  { %v1683_v45 = vsel %vm1682_vm8, %v1680_v41, %v1677_v40  ;;  %v1702_v46 = vadd.f32 %v1674_v43, %v1646_v39 }
 0x739   :  { %v1703_v49 = vadd.f32 %v1683_v45, %v1647_v42 }
 0x73a   :  { %v1706_v50 = vsub.f32 %v1642_v44, %v1702_v46 }
 0x73b   :  { %v1707_v51 = vsub.f32 %v1643_v48, %v1703_v49 }
 0x73d   :  { %v1710_v52 = vadd.f32 %v1707_v51, %v1706_v50 }
 0x73f   :  { %1711 = vadd.xlane.f32.xlu1 %v1710_v52 }
 0x7cc   :  { %v1712_v56 = vpop.xlane.xlu1 %1711 }
 0x7cd   :  { %v1716_v58 = vadd.f32 %v1712_v56, %v1640_v54 }
 0x7cf   :  { %v1727_v60 = vsel %vm1725_vm9, %v1716_v58, 0.0 }
 0x7d0   :  { %v1730_v61 = vsel %vm1729_vm10, %v1727_v60, 0.0 }
 0x7d1   :  { %1733 = vadd.xlane.f32.xlu0 %v1730_v61 }
 0x7d2   :  { %2548 = shalt.err (!%p2545_p4)
}
 0x7d3   :  { %s2549_s11 = scalar_lea.hbm %s2980_s14, 256 }
 0x7d4   :  { %p2550_p5 = scmp.ne.s32.totalorder %s2980_s14, %s2549_s11  ;;  %p2553_p6 = scmp.lt.u32.totalorder %s2549_s11, %s2980_s14 }
 0x7d6   :  { %p2555_p7 = pnand %p2553_p6, %p2550_p5 }
 0x7d8   :  { %2558 = shalt.err (!%p2555_p7)
}
 0x7d9   :  { %1755 = dma.vmem_to_hbm [thread:$0]  %s1750_s27, 256, %s2980_s14, [#allocation4], %s2590_s28, %s2590_s28, %s2591_s29  }
 0x7da   :  { %s2984_s6 = sld [smem:[#allocation38_spill]] }
 0x7e0   :  { %s2559_s9 = scalar_lea.hbm %s2984_s6, 16 }
 0x7e1   :  { %p2560_p8 = scmp.ne.s32.totalorder %s2984_s6, %s2559_s9  ;;  %p2563_p9 = scmp.lt.u32.totalorder %s2559_s9, %s2984_s6 }
 0x7e3   :  { %p2565_p10 = pnand %p2563_p9, %p2560_p8 }
 0x85e   :  { %v1734_v55 = vpop.xlane.xlu0 %1733 }
 0x85f   :  { %v1735_v18 = vrot.slane %v1734_v55, 4 }
 0x861   :  { %v1736_v57 = vadd.f32 %v1735_v18, %v1734_v55 }
 0x863   :  { %v1737_v59 = vrot.slane %v1736_v57, 2 }
 0x865   :  { %v1738_v62 = vadd.f32 %v1737_v59, %v1736_v57 }
 0x867   :  { %v1739_v63 = vrot.slane %v1738_v62, 1 }
 0x869   :  { %v1740_v0 = vadd.f32 %v1739_v63, %v1738_v62 }
 0x86b   :  { %1957 = vpush %v1740_v0 }
 0x89c   :  { %s1958_s19 = spop %1957 }
 0x89d   :  { %1743 = sst [smem:[#allocation27]] %s1958_s19 }
 0x89e   :  { %2568 = shalt.err (!%p2565_p10)
}
 0x89f   :  { %s2613_s28 = smov [#allocation27]  }
 0x8a0   :  { %1763 = dma.smem_to_hbm %s2613_s28, 16, %s2984_s6, [#allocation5]  }
 0x8a1   :  { %2585 = dma.done.wait [#allocation4], 256  }
 0x8a2   :  { %2586 = vsyncadd [#allocation4], 4294967040 }
 0x8a3   :  { %2587 = dma.done.wait [#allocation5], 16  }
 0x8a4   :  { %2588 = vsyncadd [#allocation5], 4294967280 }
 0x8a5   :  { %1770 = sfence }
 0x8a6   :  { %1771 = vsyncpa [#allocation3], 1 }
 0x8a7   :  { %1772 = vsyncpa [#allocation7], 1 }
 0x8a8   :  { %1773 = vsyncpa [#allocation10], 1 }
 0x8a9   :  { %1774 = vsyncpa [#allocation13], 1 }
 0x8aa   :  { %1775 = vsyncpa [#allocation16], 1 }
 0x8ab   :  { %1776 = vsyncpa [#allocation19], 1 }
 0x8ac   :  { %1777 = vsyncpa [#allocation22], 1 }
 0x8ad   :  { %1778 = vsyncpa [#allocation25], 1 }
 0x8ae   :  { %1779 = vsyncpa [#allocation4], 1 }
 0x8af   :  { %1780 = vsyncpa [#allocation5], 1 }

</bundles_post_ra>
